<compile_context>
chip_gen: v7x
topology: tpu7x:2x2x1
jax: 0.10.0
libtpu: 0.0.40
codegen_flags: <defaults>
</compile_context>

<pallas_src>
import functools

import jax
import jax.numpy as jnp
import numpy as np
from jax import lax
from jax.experimental import pallas as pl
from jax.experimental.pallas import tpu as pltpu

# ----------------------------- small config (matches the module) -----------------------------
BATCH = 2
SEQ = 8
HIDDEN = 32
NUM_HEADS = 4
HEAD_DIM = HIDDEN // NUM_HEADS
INTERMEDIATE = 64
NUM_LAYERS = 2
LN_EPS = 1e-5


def _layernorm(h, g, b, eps):
    mu = jnp.mean(h, axis=-1, keepdims=True)
    c = h - mu
    var = jnp.mean(c * c, axis=-1, keepdims=True)
    return c * lax.rsqrt(var + eps) * g + b


def _gelu_tanh(x):
    # gelu(..., approximate=True) from the reference module
    return 0.5 * x * (1.0 + jnp.tanh(jnp.sqrt(2.0 / jnp.pi) * (x + 0.044715 * x ** 3)))


def clip_encoder_kernel(x_ref, w_qkv_ref, w_o_ref, w_fc1_ref, w_fc2_ref, vec_ref, o_ref,
                        *, num_layers, num_heads, eps):
    """One grid step == one batch element's (S, D) hidden state through ALL encoder layers.

    Weight refs carry the full L-layer stacks (constant index_map -> DMA'd once, resident
    in VMEM); the Python loop over layers is unrolled at trace time.
    """
    h = x_ref[0]                       # (S, D) f32
    S, D = h.shape
    Dh = D // num_heads

    for l in range(num_layers):
        w_qkv = w_qkv_ref[l]           # (D, 3D) = [Wq*scale | Wk | Wv]
        w_o = w_o_ref[l]               # (D, D)
        w1 = w_fc1_ref[l]              # (D, I)
        w2 = w_fc2_ref[l]              # (I, D)
        vec = vec_ref[l]               # (3, W) packed small vectors
        I = w1.shape[1]

        ln1_g = vec[0:1, 0:D]
        ln1_b = vec[0:1, D:2 * D]
        ln2_g = vec[0:1, 2 * D:3 * D]
        ln2_b = vec[0:1, 3 * D:4 * D]
        b_qkv = vec[1:2, 0:3 * D]      # [bq*scale | bk | bv]
        b_o = vec[1:2, 3 * D:4 * D]
        b1 = vec[2:3, 0:I]
        b2 = vec[2:3, I:I + D]

        # ---------------- LayerNorm 1 + fused QKV projection ----------------
        residual = h
        hn = _layernorm(h, ln1_g, ln1_b, eps)
        qkv = jnp.dot(hn, w_qkv, preferred_element_type=jnp.float32) + b_qkv   # (S, 3D)

        # ---------------- head-batched multi-head self-attention ----------------
        q = qkv[:, 0:D].reshape(S, num_heads, Dh).transpose(1, 0, 2)           # (H, S, Dh)
        k = qkv[:, D:2 * D].reshape(S, num_heads, Dh).transpose(1, 0, 2)       # (H, S, Dh)
        v = qkv[:, 2 * D:3 * D].reshape(S, num_heads, Dh).transpose(1, 0, 2)   # (H, S, Dh)

        s = jnp.einsum("hqd,hkd->hqk", q, k,
                       preferred_element_type=jnp.float32)                     # (H, S, S)
        s = s - jnp.max(s, axis=-1, keepdims=True)
        p = jnp.exp(s)
        p = p / jnp.sum(p, axis=-1, keepdims=True)                             # exact softmax
        ctx = jnp.einsum("hqk,hkd->hqd", p, v,
                         preferred_element_type=jnp.float32)                   # (H, S, Dh)
        ctx = ctx.transpose(1, 0, 2).reshape(S, D)

        h = residual + jnp.dot(ctx, w_o, preferred_element_type=jnp.float32) + b_o

        # ---------------- LayerNorm 2 + MLP ----------------
        residual = h
        hn = _layernorm(h, ln2_g, ln2_b, eps)
        m = jnp.dot(hn, w1, preferred_element_type=jnp.float32) + b1
        m = _gelu_tanh(m)
        m = jnp.dot(m, w2, preferred_element_type=jnp.float32) + b2
        h = residual + m

    o_ref[0] = h


@jax.jit
def clip_encoder(inputs_embeds, packed):
    """CLIPEncoder.forward (attention_mask=None, causal_attention_mask=None,
    output_attentions=False, output_hidden_states=False) -> last_hidden_state."""
    B, S, D = inputs_embeds.shape
    L = packed["w_qkv"].shape[0]
    I = packed["w_fc1"].shape[2]
    W = packed["vecs"].shape[2]

    kernel = functools.partial(clip_encoder_kernel,
                               num_layers=L, num_heads=NUM_HEADS, eps=LN_EPS)

    out = pl.pallas_call(
        kernel,
        out_shape=jax.ShapeDtypeStruct((B, S, D), jnp.float32),
        grid_spec=pltpu.PrefetchScalarGridSpec(
            num_scalar_prefetch=0,
            grid=(B,),                                              # batch, parallel
            in_specs=[
                pl.BlockSpec((1, S, D), lambda b: (b, 0, 0)),       # this batch element
                pl.BlockSpec((L, D, 3 * D), lambda b: (0, 0, 0)),   # [Wq*s|Wk|Wv], all layers
                pl.BlockSpec((L, D, D), lambda b: (0, 0, 0)),       # Wo, all layers
                pl.BlockSpec((L, D, I), lambda b: (0, 0, 0)),       # fc1 weight, all layers
                pl.BlockSpec((L, I, D), lambda b: (0, 0, 0)),       # fc2 weight, all layers
                pl.BlockSpec((L, 3, W), lambda b: (0, 0, 0)),       # packed LN/biases slab
            ],
            out_specs=pl.BlockSpec((1, S, D), lambda b: (b, 0, 0)),
        ),
        compiler_params=pltpu.CompilerParams(
            dimension_semantics=("parallel",)),
    )(inputs_embeds, packed["w_qkv"], packed["w_o"], packed["w_fc1"],
      packed["w_fc2"], packed["vecs"])
    return out


# ----------------------------- deterministic parameter init -----------------------------
def init_layer_params(key):
    D, I = HIDDEN, INTERMEDIATE
    ks = jax.random.split(key, 16)
    n = lambda k, shape, s=0.02: (s * jax.random.normal(k, shape)).astype(jnp.float32)
    return {
        "ln1_w": 1.0 + n(ks[0], (D,), 0.1), "ln1_b": n(ks[1], (D,), 0.05),
        "wq": n(ks[2], (D, D)), "bq": n(ks[3], (D,)),
        "wk": n(ks[4], (D, D)), "bk": n(ks[5], (D,)),
        "wv": n(ks[6], (D, D)), "bv": n(ks[7], (D,)),
        "wo": n(ks[8], (D, D)), "bo": n(ks[9], (D,)),
        "ln2_w": 1.0 + n(ks[10], (D,), 0.1), "ln2_b": n(ks[11], (D,), 0.05),
        "w1": n(ks[12], (D, I)), "b1": n(ks[13], (I,)),
        "w2": n(ks[14], (I, D)), "b2": n(ks[15], (D,)),
    }


def pack_params(params_list):
    """Stack per-layer params into the packed layout the kernel consumes.
    The attention scale is folded into Wq / bq here (one-time constant fold)."""
    D, I = HIDDEN, INTERMEDIATE
    scale = jnp.float32(HEAD_DIM ** (-0.5))
    W = max(4 * D, I + D)                       # lane width of the small-vector slab

    def stack(fn):
        return jnp.stack([fn(p) for p in params_list], axis=0)

    def vec_rows(p):
        pad = lambda r: jnp.pad(r, (0, W - r.shape[0]))
        row0 = jnp.concatenate([p["ln1_w"], p["ln1_b"], p["ln2_w"], p["ln2_b"]])
        row1 = jnp.concatenate([p["bq"] * scale, p["bk"], p["bv"], p["bo"]])
        row2 = jnp.concatenate([p["b1"], p["b2"]])
        return jnp.stack([pad(row0), pad(row1), pad(row2)], axis=0)   # (3, W)

    return {
        "w_qkv": stack(lambda p: jnp.concatenate(
            [p["wq"] * scale, p["wk"], p["wv"]], axis=1)),            # (L, D, 3D)
        "w_o": stack(lambda p: p["wo"]),                              # (L, D, D)
        "w_fc1": stack(lambda p: p["w1"]),                            # (L, D, I)
        "w_fc2": stack(lambda p: p["w2"]),                            # (L, I, D)
        "vecs": stack(vec_rows),                                      # (L, 3, W)
    }


# ------------------------------------ pure-JAX reference --------------------------------
def ref_encoder(x, params_list):
    scale = HEAD_DIM ** (-0.5)

    def ln(h, w, b):
        mu = h.mean(-1, keepdims=True)
        var = ((h - mu) ** 2).mean(-1, keepdims=True)
        return (h - mu) / jnp.sqrt(var + LN_EPS) * w + b

    for p in params_list:
        res = x
        h = ln(x, p["ln1_w"], p["ln1_b"])
        q = (h @ p["wq"] + p["bq"]) * scale
        k = h @ p["wk"] + p["bk"]
        v = h @ p["wv"] + p["bv"]
        B, S, D = h.shape
        qh = q.reshape(B, S, NUM_HEADS, HEAD_DIM).transpose(0, 2, 1, 3)
        kh = k.reshape(B, S, NUM_HEADS, HEAD_DIM).transpose(0, 2, 1, 3)
        vh = v.reshape(B, S, NUM_HEADS, HEAD_DIM).transpose(0, 2, 1, 3)
        s = jnp.einsum("bhqd,bhkd->bhqk", qh, kh)
        pw = jax.nn.softmax(s, axis=-1)
        ao = jnp.einsum("bhqk,bhkd->bhqd", pw, vh).transpose(0, 2, 1, 3).reshape(B, S, D)
        ao = ao @ p["wo"] + p["bo"]
        x = res + ao
        res = x
        h2 = ln(x, p["ln2_w"], p["ln2_b"])
        m = h2 @ p["w1"] + p["b1"]
        m = 0.5 * m * (1 + jnp.tanh(jnp.sqrt(2.0 / jnp.pi) * (m + 0.044715 * m ** 3)))
        m = m @ p["w2"] + p["b2"]
        x = res + m
    return x


if __name__ == "__main__":
    key = jax.random.PRNGKey(0)
    k_in, *k_layers = jax.random.split(key, NUM_LAYERS + 1)

    inputs_embeds = jax.random.normal(k_in, (BATCH, SEQ, HIDDEN), dtype=jnp.float32)
    params_list = [init_layer_params(k) for k in k_layers]
    packed = pack_params(params_list)

    out = clip_encoder(inputs_embeds, packed)
    out = jax.block_until_ready(out)

    expected = ref_encoder(inputs_embeds, params_list)
    np.testing.assert_allclose(np.asarray(out), np.asarray(expected), rtol=1e-4, atol=1e-4)

    print("KERNEL_OK")
</pallas_src>

<mosaic_0001>
module attributes {stable_mosaic.version = 11 : i64} {
  func.func @clip_encoder_kernel(%arg0: i32, %arg1: memref<1x8x32xf32, #tpu.memory_space<vmem>>, %arg2: memref<2x32x96xf32, #tpu.memory_space<vmem>>, %arg3: memref<2x32x32xf32, #tpu.memory_space<vmem>>, %arg4: memref<2x32x64xf32, #tpu.memory_space<vmem>>, %arg5: memref<2x64x32xf32, #tpu.memory_space<vmem>>, %arg6: memref<2x3x128xf32, #tpu.memory_space<vmem>>, %arg7: memref<1x8x32xf32, #tpu.memory_space<vmem>>) attributes {dimension_semantics = [#tpu.dimension_semantics<parallel>], iteration_bounds = array<i64: 2>, scalar_prefetch = 0 : i64, scratch_operands = 0 : i64, tpu.core_type = #tpu.core_type<tc>, window_params = [{transform_indices = @transform_0, window_bounds = array<i64: 1, 8, 32>}, {pipeline_mode = #tpu.pipeline_mode<synchronous>, transform_indices = @transform_1, window_bounds = array<i64: 2, 32, 96>}, {pipeline_mode = #tpu.pipeline_mode<synchronous>, transform_indices = @transform_2, window_bounds = array<i64: 2, 32, 32>}, {pipeline_mode = #tpu.pipeline_mode<synchronous>, transform_indices = @transform_3, window_bounds = array<i64: 2, 32, 64>}, {pipeline_mode = #tpu.pipeline_mode<synchronous>, transform_indices = @transform_4, window_bounds = array<i64: 2, 64, 32>}, {pipeline_mode = #tpu.pipeline_mode<synchronous>, transform_indices = @transform_5, window_bounds = array<i64: 2, 3, 128>}, {transform_indices = @transform_6, window_bounds = array<i64: 1, 8, 32>}]} {
    %c0 = arith.constant 0 : index
    %c0_0 = arith.constant 0 : index
    %c0_1 = arith.constant 0 : index
    %0 = vector.load %arg1[%c0, %c0_0, %c0_1] : memref<1x8x32xf32, #tpu.memory_space<vmem>>, vector<1x8x32xf32>
    %1 = vector.shape_cast %0 : vector<1x8x32xf32> to vector<8x32xf32>
    %c0_2 = arith.constant 0 : index
    %c0_3 = arith.constant 0 : index
    %c0_4 = arith.constant 0 : index
    %2 = vector.load %arg2[%c0_2, %c0_3, %c0_4] : memref<2x32x96xf32, #tpu.memory_space<vmem>>, vector<1x32x96xf32>
    %3 = vector.shape_cast %2 : vector<1x32x96xf32> to vector<32x96xf32>
    %c0_5 = arith.constant 0 : index
    %c0_6 = arith.constant 0 : index
    %c0_7 = arith.constant 0 : index
    %4 = vector.load %arg3[%c0_5, %c0_6, %c0_7] : memref<2x32x32xf32, #tpu.memory_space<vmem>>, vector<1x32x32xf32>
    %5 = vector.shape_cast %4 : vector<1x32x32xf32> to vector<32x32xf32>
    %c0_8 = arith.constant 0 : index
    %c0_9 = arith.constant 0 : index
    %c0_10 = arith.constant 0 : index
    %6 = vector.load %arg4[%c0_8, %c0_9, %c0_10] : memref<2x32x64xf32, #tpu.memory_space<vmem>>, vector<1x32x64xf32>
    %7 = vector.shape_cast %6 : vector<1x32x64xf32> to vector<32x64xf32>
    %c0_11 = arith.constant 0 : index
    %c0_12 = arith.constant 0 : index
    %c0_13 = arith.constant 0 : index
    %8 = vector.load %arg5[%c0_11, %c0_12, %c0_13] : memref<2x64x32xf32, #tpu.memory_space<vmem>>, vector<1x64x32xf32>
    %9 = vector.shape_cast %8 : vector<1x64x32xf32> to vector<64x32xf32>
    %c0_14 = arith.constant 0 : index
    %c0_15 = arith.constant 0 : index
    %c0_16 = arith.constant 0 : index
    %10 = vector.load %arg6[%c0_14, %c0_15, %c0_16] : memref<2x3x128xf32, #tpu.memory_space<vmem>>, vector<1x3x128xf32>
    %11 = vector.shape_cast %10 : vector<1x3x128xf32> to vector<3x128xf32>
    %12 = vector.extract_strided_slice %11 {offsets = [0, 0], sizes = [1, 32], strides = [1, 1]} : vector<3x128xf32> to vector<1x32xf32>
    %13 = vector.extract_strided_slice %11 {offsets = [0, 32], sizes = [1, 32], strides = [1, 1]} : vector<3x128xf32> to vector<1x32xf32>
    %14 = vector.extract_strided_slice %11 {offsets = [0, 64], sizes = [1, 32], strides = [1, 1]} : vector<3x128xf32> to vector<1x32xf32>
    %15 = vector.extract_strided_slice %11 {offsets = [0, 96], sizes = [1, 32], strides = [1, 1]} : vector<3x128xf32> to vector<1x32xf32>
    %16 = vector.extract_strided_slice %11 {offsets = [1, 0], sizes = [1, 96], strides = [1, 1]} : vector<3x128xf32> to vector<1x96xf32>
    %17 = vector.extract_strided_slice %11 {offsets = [1, 96], sizes = [1, 32], strides = [1, 1]} : vector<3x128xf32> to vector<1x32xf32>
    %18 = vector.extract_strided_slice %11 {offsets = [2, 0], sizes = [1, 64], strides = [1, 1]} : vector<3x128xf32> to vector<1x64xf32>
    %19 = vector.extract_strided_slice %11 {offsets = [2, 64], sizes = [1, 32], strides = [1, 1]} : vector<3x128xf32> to vector<1x32xf32>
    %cst = arith.constant dense<0.000000e+00> : vector<8xf32>
    %20 = vector.multi_reduction <add>, %1, %cst [1] : vector<8x32xf32> to vector<8xf32>
    %21 = vector.shape_cast %20 : vector<8xf32> to vector<8x1xf32>
    %cst_17 = arith.constant 3.200000e+01 : f32
    %22 = vector.broadcast %cst_17 : f32 to vector<8x1xf32>
    %23 = arith.divf %21, %22 : vector<8x1xf32>
    %24 = vector.broadcast %23 : vector<8x1xf32> to vector<8x32xf32>
    %25 = arith.subf %1, %24 : vector<8x32xf32>
    %26 = arith.mulf %25, %25 : vector<8x32xf32>
    %cst_18 = arith.constant dense<0.000000e+00> : vector<8xf32>
    %27 = vector.multi_reduction <add>, %26, %cst_18 [1] : vector<8x32xf32> to vector<8xf32>
    %28 = vector.shape_cast %27 : vector<8xf32> to vector<8x1xf32>
    %cst_19 = arith.constant 3.200000e+01 : f32
    %29 = vector.broadcast %cst_19 : f32 to vector<8x1xf32>
    %30 = arith.divf %28, %29 : vector<8x1xf32>
    %cst_20 = arith.constant 9.99999974E-6 : f32
    %31 = vector.broadcast %cst_20 : f32 to vector<8x1xf32>
    %32 = arith.addf %30, %31 : vector<8x1xf32>
    %33 = math.rsqrt %32 : vector<8x1xf32>
    %34 = vector.broadcast %33 : vector<8x1xf32> to vector<8x32xf32>
    %35 = arith.mulf %25, %34 : vector<8x32xf32>
    %36 = vector.broadcast %12 : vector<1x32xf32> to vector<8x32xf32>
    %37 = arith.mulf %35, %36 : vector<8x32xf32>
    %38 = vector.broadcast %13 : vector<1x32xf32> to vector<8x32xf32>
    %39 = arith.addf %37, %38 : vector<8x32xf32>
    %cst_21 = arith.constant dense<0.000000e+00> : vector<8x96xf32>
    %40 = tpu.matmul %39, %3, %cst_21 {dimension_numbers = #tpu.dot_dimension_numbers<[1], [0], [0], [1], [0, 0, 1, 1], [], []>} : vector<8x32xf32>, vector<32x96xf32>, vector<8x96xf32> -> vector<8x96xf32>
    %41 = vector.broadcast %16 : vector<1x96xf32> to vector<8x96xf32>
    %42 = arith.addf %40, %41 : vector<8x96xf32>
    %43 = vector.extract_strided_slice %42 {offsets = [0, 0], sizes = [8, 32], strides = [1, 1]} : vector<8x96xf32> to vector<8x32xf32>
    %44 = vector.shape_cast %43 : vector<8x32xf32> to vector<8x4x8xf32>
    %45 = tpu.transpose %44, [1, 0, 2] : vector<8x4x8xf32> -> vector<4x8x8xf32>
    %46 = vector.extract_strided_slice %42 {offsets = [0, 32], sizes = [8, 32], strides = [1, 1]} : vector<8x96xf32> to vector<8x32xf32>
    %47 = vector.shape_cast %46 : vector<8x32xf32> to vector<8x4x8xf32>
    %48 = tpu.transpose %47, [1, 0, 2] : vector<8x4x8xf32> -> vector<4x8x8xf32>
    %49 = vector.extract_strided_slice %42 {offsets = [0, 64], sizes = [8, 32], strides = [1, 1]} : vector<8x96xf32> to vector<8x32xf32>
    %50 = vector.shape_cast %49 : vector<8x32xf32> to vector<8x4x8xf32>
    %51 = tpu.transpose %50, [1, 0, 2] : vector<8x4x8xf32> -> vector<4x8x8xf32>
    "tpu.trace_start"() <{level = 10 : i32, message = "hqd,hkd->hqk"}> : () -> ()
    %cst_22 = arith.constant dense<0.000000e+00> : vector<4x8x8xf32>
    %52 = tpu.matmul %45, %48, %cst_22 {dimension_numbers = #tpu.dot_dimension_numbers<[2], [2], [1], [1], [0, 0, 0, 1, 1, 1], [0], [0]>} : vector<4x8x8xf32>, vector<4x8x8xf32>, vector<4x8x8xf32> -> vector<4x8x8xf32>
    "tpu.trace_stop"() : () -> ()
    %cst_23 = arith.constant dense<0xFF800000> : vector<4x8xf32>
    %53 = vector.multi_reduction <maximumf>, %52, %cst_23 [2] : vector<4x8x8xf32> to vector<4x8xf32>
    %54 = vector.shape_cast %53 : vector<4x8xf32> to vector<4x8x1xf32>
    %55 = vector.broadcast %54 : vector<4x8x1xf32> to vector<4x8x8xf32>
    %56 = arith.subf %52, %55 : vector<4x8x8xf32>
    %57 = math.exp %56 : vector<4x8x8xf32>
    %cst_24 = arith.constant dense<0.000000e+00> : vector<4x8xf32>
    %58 = vector.multi_reduction <add>, %57, %cst_24 [2] : vector<4x8x8xf32> to vector<4x8xf32>
    %59 = vector.shape_cast %58 : vector<4x8xf32> to vector<4x8x1xf32>
    %60 = vector.broadcast %59 : vector<4x8x1xf32> to vector<4x8x8xf32>
    %61 = arith.divf %57, %60 : vector<4x8x8xf32>
    "tpu.trace_start"() <{level = 10 : i32, message = "hqk,hkd->hqd"}> : () -> ()
    %cst_25 = arith.constant dense<0.000000e+00> : vector<4x8x8xf32>
    %62 = tpu.matmul %61, %51, %cst_25 {dimension_numbers = #tpu.dot_dimension_numbers<[2], [1], [1], [2], [0, 0, 0, 1, 1, 2], [0], [0]>} : vector<4x8x8xf32>, vector<4x8x8xf32>, vector<4x8x8xf32> -> vector<4x8x8xf32>
    "tpu.trace_stop"() : () -> ()
    %63 = tpu.transpose %62, [1, 0, 2] : vector<4x8x8xf32> -> vector<8x4x8xf32>
    %64 = vector.shape_cast %63 : vector<8x4x8xf32> to vector<8x32xf32>
    %cst_26 = arith.constant dense<0.000000e+00> : vector<8x32xf32>
    %65 = tpu.matmul %64, %5, %cst_26 {dimension_numbers = #tpu.dot_dimension_numbers<[1], [0], [0], [1], [0, 0, 1, 1], [], []>} : vector<8x32xf32>, vector<32x32xf32>, vector<8x32xf32> -> vector<8x32xf32>
    %66 = arith.addf %1, %65 : vector<8x32xf32>
    %67 = vector.broadcast %17 : vector<1x32xf32> to vector<8x32xf32>
    %68 = arith.addf %66, %67 : vector<8x32xf32>
    %cst_27 = arith.constant dense<0.000000e+00> : vector<8xf32>
    %69 = vector.multi_reduction <add>, %68, %cst_27 [1] : vector<8x32xf32> to vector<8xf32>
    %70 = vector.shape_cast %69 : vector<8xf32> to vector<8x1xf32>
    %cst_28 = arith.constant 3.200000e+01 : f32
    %71 = vector.broadcast %cst_28 : f32 to vector<8x1xf32>
    %72 = arith.divf %70, %71 : vector<8x1xf32>
    %73 = vector.broadcast %72 : vector<8x1xf32> to vector<8x32xf32>
    %74 = arith.subf %68, %73 : vector<8x32xf32>
    %75 = arith.mulf %74, %74 : vector<8x32xf32>
    %cst_29 = arith.constant dense<0.000000e+00> : vector<8xf32>
    %76 = vector.multi_reduction <add>, %75, %cst_29 [1] : vector<8x32xf32> to vector<8xf32>
    %77 = vector.shape_cast %76 : vector<8xf32> to vector<8x1xf32>
    %cst_30 = arith.constant 3.200000e+01 : f32
    %78 = vector.broadcast %cst_30 : f32 to vector<8x1xf32>
    %79 = arith.divf %77, %78 : vector<8x1xf32>
    %cst_31 = arith.constant 9.99999974E-6 : f32
    %80 = vector.broadcast %cst_31 : f32 to vector<8x1xf32>
    %81 = arith.addf %79, %80 : vector<8x1xf32>
    %82 = math.rsqrt %81 : vector<8x1xf32>
    %83 = vector.broadcast %82 : vector<8x1xf32> to vector<8x32xf32>
    %84 = arith.mulf %74, %83 : vector<8x32xf32>
    %85 = vector.broadcast %14 : vector<1x32xf32> to vector<8x32xf32>
    %86 = arith.mulf %84, %85 : vector<8x32xf32>
    %87 = vector.broadcast %15 : vector<1x32xf32> to vector<8x32xf32>
    %88 = arith.addf %86, %87 : vector<8x32xf32>
    %cst_32 = arith.constant dense<0.000000e+00> : vector<8x64xf32>
    %89 = tpu.matmul %88, %7, %cst_32 {dimension_numbers = #tpu.dot_dimension_numbers<[1], [0], [0], [1], [0, 0, 1, 1], [], []>} : vector<8x32xf32>, vector<32x64xf32>, vector<8x64xf32> -> vector<8x64xf32>
    %90 = vector.broadcast %18 : vector<1x64xf32> to vector<8x64xf32>
    %91 = arith.addf %89, %90 : vector<8x64xf32>
    %cst_33 = arith.constant 5.000000e-01 : f32
    %92 = vector.broadcast %cst_33 : f32 to vector<8x64xf32>
    %93 = arith.mulf %92, %91 : vector<8x64xf32>
    %cst_34 = arith.constant 0.636619746 : f32
    %94 = math.sqrt %cst_34 : f32
    %95 = arith.mulf %91, %91 : vector<8x64xf32>
    %96 = arith.mulf %91, %95 : vector<8x64xf32>
    %cst_35 = arith.constant 4.471500e-02 : f32
    %97 = vector.broadcast %cst_35 : f32 to vector<8x64xf32>
    %98 = arith.mulf %97, %96 : vector<8x64xf32>
    %99 = arith.addf %91, %98 : vector<8x64xf32>
    %100 = vector.broadcast %94 : f32 to vector<8x64xf32>
    %101 = arith.mulf %100, %99 : vector<8x64xf32>
    %102 = math.tanh %101 : vector<8x64xf32>
    %cst_36 = arith.constant 1.000000e+00 : f32
    %103 = vector.broadcast %cst_36 : f32 to vector<8x64xf32>
    %104 = arith.addf %103, %102 : vector<8x64xf32>
    %105 = arith.mulf %93, %104 : vector<8x64xf32>
    %cst_37 = arith.constant dense<0.000000e+00> : vector<8x32xf32>
    %106 = tpu.matmul %105, %9, %cst_37 {dimension_numbers = #tpu.dot_dimension_numbers<[1], [0], [0], [1], [0, 0, 1, 1], [], []>} : vector<8x64xf32>, vector<64x32xf32>, vector<8x32xf32> -> vector<8x32xf32>
    %107 = vector.broadcast %19 : vector<1x32xf32> to vector<8x32xf32>
    %108 = arith.addf %106, %107 : vector<8x32xf32>
    %109 = arith.addf %68, %108 : vector<8x32xf32>
    %c1 = arith.constant 1 : index
    %c0_38 = arith.constant 0 : index
    %c0_39 = arith.constant 0 : index
    %110 = vector.load %arg2[%c1, %c0_38, %c0_39] : memref<2x32x96xf32, #tpu.memory_space<vmem>>, vector<1x32x96xf32>
    %111 = vector.shape_cast %110 : vector<1x32x96xf32> to vector<32x96xf32>
    %c1_40 = arith.constant 1 : index
    %c0_41 = arith.constant 0 : index
    %c0_42 = arith.constant 0 : index
    %112 = vector.load %arg3[%c1_40, %c0_41, %c0_42] : memref<2x32x32xf32, #tpu.memory_space<vmem>>, vector<1x32x32xf32>
    %113 = vector.shape_cast %112 : vector<1x32x32xf32> to vector<32x32xf32>
    %c1_43 = arith.constant 1 : index
    %c0_44 = arith.constant 0 : index
    %c0_45 = arith.constant 0 : index
    %114 = vector.load %arg4[%c1_43, %c0_44, %c0_45] : memref<2x32x64xf32, #tpu.memory_space<vmem>>, vector<1x32x64xf32>
    %115 = vector.shape_cast %114 : vector<1x32x64xf32> to vector<32x64xf32>
    %c1_46 = arith.constant 1 : index
    %c0_47 = arith.constant 0 : index
    %c0_48 = arith.constant 0 : index
    %116 = vector.load %arg5[%c1_46, %c0_47, %c0_48] : memref<2x64x32xf32, #tpu.memory_space<vmem>>, vector<1x64x32xf32>
    %117 = vector.shape_cast %116 : vector<1x64x32xf32> to vector<64x32xf32>
    %c1_49 = arith.constant 1 : index
    %c0_50 = arith.constant 0 : index
    %c0_51 = arith.constant 0 : index
    %118 = vector.load %arg6[%c1_49, %c0_50, %c0_51] : memref<2x3x128xf32, #tpu.memory_space<vmem>>, vector<1x3x128xf32>
    %119 = vector.shape_cast %118 : vector<1x3x128xf32> to vector<3x128xf32>
    %120 = vector.extract_strided_slice %119 {offsets = [0, 0], sizes = [1, 32], strides = [1, 1]} : vector<3x128xf32> to vector<1x32xf32>
    %121 = vector.extract_strided_slice %119 {offsets = [0, 32], sizes = [1, 32], strides = [1, 1]} : vector<3x128xf32> to vector<1x32xf32>
    %122 = vector.extract_strided_slice %119 {offsets = [0, 64], sizes = [1, 32], strides = [1, 1]} : vector<3x128xf32> to vector<1x32xf32>
    %123 = vector.extract_strided_slice %119 {offsets = [0, 96], sizes = [1, 32], strides = [1, 1]} : vector<3x128xf32> to vector<1x32xf32>
    %124 = vector.extract_strided_slice %119 {offsets = [1, 0], sizes = [1, 96], strides = [1, 1]} : vector<3x128xf32> to vector<1x96xf32>
    %125 = vector.extract_strided_slice %119 {offsets = [1, 96], sizes = [1, 32], strides = [1, 1]} : vector<3x128xf32> to vector<1x32xf32>
    %126 = vector.extract_strided_slice %119 {offsets = [2, 0], sizes = [1, 64], strides = [1, 1]} : vector<3x128xf32> to vector<1x64xf32>
    %127 = vector.extract_strided_slice %119 {offsets = [2, 64], sizes = [1, 32], strides = [1, 1]} : vector<3x128xf32> to vector<1x32xf32>
    %cst_52 = arith.constant dense<0.000000e+00> : vector<8xf32>
    %128 = vector.multi_reduction <add>, %109, %cst_52 [1] : vector<8x32xf32> to vector<8xf32>
    %129 = vector.shape_cast %128 : vector<8xf32> to vector<8x1xf32>
    %cst_53 = arith.constant 3.200000e+01 : f32
    %130 = vector.broadcast %cst_53 : f32 to vector<8x1xf32>
    %131 = arith.divf %129, %130 : vector<8x1xf32>
    %132 = vector.broadcast %131 : vector<8x1xf32> to vector<8x32xf32>
    %133 = arith.subf %109, %132 : vector<8x32xf32>
    %134 = arith.mulf %133, %133 : vector<8x32xf32>
    %cst_54 = arith.constant dense<0.000000e+00> : vector<8xf32>
    %135 = vector.multi_reduction <add>, %134, %cst_54 [1] : vector<8x32xf32> to vector<8xf32>
    %136 = vector.shape_cast %135 : vector<8xf32> to vector<8x1xf32>
    %cst_55 = arith.constant 3.200000e+01 : f32
    %137 = vector.broadcast %cst_55 : f32 to vector<8x1xf32>
    %138 = arith.divf %136, %137 : vector<8x1xf32>
    %cst_56 = arith.constant 9.99999974E-6 : f32
    %139 = vector.broadcast %cst_56 : f32 to vector<8x1xf32>
    %140 = arith.addf %138, %139 : vector<8x1xf32>
    %141 = math.rsqrt %140 : vector<8x1xf32>
    %142 = vector.broadcast %141 : vector<8x1xf32> to vector<8x32xf32>
    %143 = arith.mulf %133, %142 : vector<8x32xf32>
    %144 = vector.broadcast %120 : vector<1x32xf32> to vector<8x32xf32>
    %145 = arith.mulf %143, %144 : vector<8x32xf32>
    %146 = vector.broadcast %121 : vector<1x32xf32> to vector<8x32xf32>
    %147 = arith.addf %145, %146 : vector<8x32xf32>
    %cst_57 = arith.constant dense<0.000000e+00> : vector<8x96xf32>
    %148 = tpu.matmul %147, %111, %cst_57 {dimension_numbers = #tpu.dot_dimension_numbers<[1], [0], [0], [1], [0, 0, 1, 1], [], []>} : vector<8x32xf32>, vector<32x96xf32>, vector<8x96xf32> -> vector<8x96xf32>
    %149 = vector.broadcast %124 : vector<1x96xf32> to vector<8x96xf32>
    %150 = arith.addf %148, %149 : vector<8x96xf32>
    %151 = vector.extract_strided_slice %150 {offsets = [0, 0], sizes = [8, 32], strides = [1, 1]} : vector<8x96xf32> to vector<8x32xf32>
    %152 = vector.shape_cast %151 : vector<8x32xf32> to vector<8x4x8xf32>
    %153 = tpu.transpose %152, [1, 0, 2] : vector<8x4x8xf32> -> vector<4x8x8xf32>
    %154 = vector.extract_strided_slice %150 {offsets = [0, 32], sizes = [8, 32], strides = [1, 1]} : vector<8x96xf32> to vector<8x32xf32>
    %155 = vector.shape_cast %154 : vector<8x32xf32> to vector<8x4x8xf32>
    %156 = tpu.transpose %155, [1, 0, 2] : vector<8x4x8xf32> -> vector<4x8x8xf32>
    %157 = vector.extract_strided_slice %150 {offsets = [0, 64], sizes = [8, 32], strides = [1, 1]} : vector<8x96xf32> to vector<8x32xf32>
    %158 = vector.shape_cast %157 : vector<8x32xf32> to vector<8x4x8xf32>
    %159 = tpu.transpose %158, [1, 0, 2] : vector<8x4x8xf32> -> vector<4x8x8xf32>
    "tpu.trace_start"() <{level = 10 : i32, message = "hqd,hkd->hqk"}> : () -> ()
    %cst_58 = arith.constant dense<0.000000e+00> : vector<4x8x8xf32>
    %160 = tpu.matmul %153, %156, %cst_58 {dimension_numbers = #tpu.dot_dimension_numbers<[2], [2], [1], [1], [0, 0, 0, 1, 1, 1], [0], [0]>} : vector<4x8x8xf32>, vector<4x8x8xf32>, vector<4x8x8xf32> -> vector<4x8x8xf32>
    "tpu.trace_stop"() : () -> ()
    %cst_59 = arith.constant dense<0xFF800000> : vector<4x8xf32>
    %161 = vector.multi_reduction <maximumf>, %160, %cst_59 [2] : vector<4x8x8xf32> to vector<4x8xf32>
    %162 = vector.shape_cast %161 : vector<4x8xf32> to vector<4x8x1xf32>
    %163 = vector.broadcast %162 : vector<4x8x1xf32> to vector<4x8x8xf32>
    %164 = arith.subf %160, %163 : vector<4x8x8xf32>
    %165 = math.exp %164 : vector<4x8x8xf32>
    %cst_60 = arith.constant dense<0.000000e+00> : vector<4x8xf32>
    %166 = vector.multi_reduction <add>, %165, %cst_60 [2] : vector<4x8x8xf32> to vector<4x8xf32>
    %167 = vector.shape_cast %166 : vector<4x8xf32> to vector<4x8x1xf32>
    %168 = vector.broadcast %167 : vector<4x8x1xf32> to vector<4x8x8xf32>
    %169 = arith.divf %165, %168 : vector<4x8x8xf32>
    "tpu.trace_start"() <{level = 10 : i32, message = "hqk,hkd->hqd"}> : () -> ()
    %cst_61 = arith.constant dense<0.000000e+00> : vector<4x8x8xf32>
    %170 = tpu.matmul %169, %159, %cst_61 {dimension_numbers = #tpu.dot_dimension_numbers<[2], [1], [1], [2], [0, 0, 0, 1, 1, 2], [0], [0]>} : vector<4x8x8xf32>, vector<4x8x8xf32>, vector<4x8x8xf32> -> vector<4x8x8xf32>
    "tpu.trace_stop"() : () -> ()
    %171 = tpu.transpose %170, [1, 0, 2] : vector<4x8x8xf32> -> vector<8x4x8xf32>
    %172 = vector.shape_cast %171 : vector<8x4x8xf32> to vector<8x32xf32>
    %cst_62 = arith.constant dense<0.000000e+00> : vector<8x32xf32>
    %173 = tpu.matmul %172, %113, %cst_62 {dimension_numbers = #tpu.dot_dimension_numbers<[1], [0], [0], [1], [0, 0, 1, 1], [], []>} : vector<8x32xf32>, vector<32x32xf32>, vector<8x32xf32> -> vector<8x32xf32>
    %174 = arith.addf %109, %173 : vector<8x32xf32>
    %175 = vector.broadcast %125 : vector<1x32xf32> to vector<8x32xf32>
    %176 = arith.addf %174, %175 : vector<8x32xf32>
    %cst_63 = arith.constant dense<0.000000e+00> : vector<8xf32>
    %177 = vector.multi_reduction <add>, %176, %cst_63 [1] : vector<8x32xf32> to vector<8xf32>
    %178 = vector.shape_cast %177 : vector<8xf32> to vector<8x1xf32>
    %cst_64 = arith.constant 3.200000e+01 : f32
    %179 = vector.broadcast %cst_64 : f32 to vector<8x1xf32>
    %180 = arith.divf %178, %179 : vector<8x1xf32>
    %181 = vector.broadcast %180 : vector<8x1xf32> to vector<8x32xf32>
    %182 = arith.subf %176, %181 : vector<8x32xf32>
    %183 = arith.mulf %182, %182 : vector<8x32xf32>
    %cst_65 = arith.constant dense<0.000000e+00> : vector<8xf32>
    %184 = vector.multi_reduction <add>, %183, %cst_65 [1] : vector<8x32xf32> to vector<8xf32>
    %185 = vector.shape_cast %184 : vector<8xf32> to vector<8x1xf32>
    %cst_66 = arith.constant 3.200000e+01 : f32
    %186 = vector.broadcast %cst_66 : f32 to vector<8x1xf32>
    %187 = arith.divf %185, %186 : vector<8x1xf32>
    %cst_67 = arith.constant 9.99999974E-6 : f32
    %188 = vector.broadcast %cst_67 : f32 to vector<8x1xf32>
    %189 = arith.addf %187, %188 : vector<8x1xf32>
    %190 = math.rsqrt %189 : vector<8x1xf32>
    %191 = vector.broadcast %190 : vector<8x1xf32> to vector<8x32xf32>
    %192 = arith.mulf %182, %191 : vector<8x32xf32>
    %193 = vector.broadcast %122 : vector<1x32xf32> to vector<8x32xf32>
    %194 = arith.mulf %192, %193 : vector<8x32xf32>
    %195 = vector.broadcast %123 : vector<1x32xf32> to vector<8x32xf32>
    %196 = arith.addf %194, %195 : vector<8x32xf32>
    %cst_68 = arith.constant dense<0.000000e+00> : vector<8x64xf32>
    %197 = tpu.matmul %196, %115, %cst_68 {dimension_numbers = #tpu.dot_dimension_numbers<[1], [0], [0], [1], [0, 0, 1, 1], [], []>} : vector<8x32xf32>, vector<32x64xf32>, vector<8x64xf32> -> vector<8x64xf32>
    %198 = vector.broadcast %126 : vector<1x64xf32> to vector<8x64xf32>
    %199 = arith.addf %197, %198 : vector<8x64xf32>
    %cst_69 = arith.constant 5.000000e-01 : f32
    %200 = vector.broadcast %cst_69 : f32 to vector<8x64xf32>
    %201 = arith.mulf %200, %199 : vector<8x64xf32>
    %cst_70 = arith.constant 0.636619746 : f32
    %202 = math.sqrt %cst_70 : f32
    %203 = arith.mulf %199, %199 : vector<8x64xf32>
    %204 = arith.mulf %199, %203 : vector<8x64xf32>
    %cst_71 = arith.constant 4.471500e-02 : f32
    %205 = vector.broadcast %cst_71 : f32 to vector<8x64xf32>
    %206 = arith.mulf %205, %204 : vector<8x64xf32>
    %207 = arith.addf %199, %206 : vector<8x64xf32>
    %208 = vector.broadcast %202 : f32 to vector<8x64xf32>
    %209 = arith.mulf %208, %207 : vector<8x64xf32>
    %210 = math.tanh %209 : vector<8x64xf32>
    %cst_72 = arith.constant 1.000000e+00 : f32
    %211 = vector.broadcast %cst_72 : f32 to vector<8x64xf32>
    %212 = arith.addf %211, %210 : vector<8x64xf32>
    %213 = arith.mulf %201, %212 : vector<8x64xf32>
    %cst_73 = arith.constant dense<0.000000e+00> : vector<8x32xf32>
    %214 = tpu.matmul %213, %117, %cst_73 {dimension_numbers = #tpu.dot_dimension_numbers<[1], [0], [0], [1], [0, 0, 1, 1], [], []>} : vector<8x64xf32>, vector<64x32xf32>, vector<8x32xf32> -> vector<8x32xf32>
    %215 = vector.broadcast %127 : vector<1x32xf32> to vector<8x32xf32>
    %216 = arith.addf %214, %215 : vector<8x32xf32>
    %217 = arith.addf %176, %216 : vector<8x32xf32>
    %c0_74 = arith.constant 0 : index
    %c0_75 = arith.constant 0 : index
    %c0_76 = arith.constant 0 : index
    %218 = vector.load %arg7[%c0_74, %c0_75, %c0_76] : memref<1x8x32xf32, #tpu.memory_space<vmem>>, vector<1x8x32xf32>
    %219 = vector.shape_cast %218 : vector<1x8x32xf32> to vector<8x32xf32>
    %220 = vector.shape_cast %217 : vector<8x32xf32> to vector<1x8x32xf32>
    tpu.vector_store %arg7[%c0_74, %c0_75, %c0_76], %220 {strides = array<i32>} : memref<1x8x32xf32, #tpu.memory_space<vmem>>, vector<1x8x32xf32>,
    return
  }
  func.func @transform_0(%arg0: i32) -> (i32, i32, i32) {
    %c0_i32 = arith.constant 0 : i32
    %c0_i32_0 = arith.constant 0 : i32
    %c0_i32_1 = arith.constant 0 : i32
    return %arg0, %c0_i32, %c0_i32_0 : i32, i32, i32
  }
  func.func @transform_1(%arg0: i32) -> (i32, i32, i32) {
    %c0_i32 = arith.constant 0 : i32
    %c0_i32_0 = arith.constant 0 : i32
    %c0_i32_1 = arith.constant 0 : i32
    %c0_i32_2 = arith.constant 0 : i32
    return %c0_i32, %c0_i32_0, %c0_i32_1 : i32, i32, i32
  }
  func.func @transform_2(%arg0: i32) -> (i32, i32, i32) {
    %c0_i32 = arith.constant 0 : i32
    %c0_i32_0 = arith.constant 0 : i32
    %c0_i32_1 = arith.constant 0 : i32
    %c0_i32_2 = arith.constant 0 : i32
    return %c0_i32, %c0_i32_0, %c0_i32_1 : i32, i32, i32
  }
  func.func @transform_3(%arg0: i32) -> (i32, i32, i32) {
    %c0_i32 = arith.constant 0 : i32
    %c0_i32_0 = arith.constant 0 : i32
    %c0_i32_1 = arith.constant 0 : i32
    %c0_i32_2 = arith.constant 0 : i32
    return %c0_i32, %c0_i32_0, %c0_i32_1 : i32, i32, i32
  }
  func.func @transform_4(%arg0: i32) -> (i32, i32, i32) {
    %c0_i32 = arith.constant 0 : i32
    %c0_i32_0 = arith.constant 0 : i32
    %c0_i32_1 = arith.constant 0 : i32
    %c0_i32_2 = arith.constant 0 : i32
    return %c0_i32, %c0_i32_0, %c0_i32_1 : i32, i32, i32
  }
  func.func @transform_5(%arg0: i32) -> (i32, i32, i32) {
    %c0_i32 = arith.constant 0 : i32
    %c0_i32_0 = arith.constant 0 : i32
    %c0_i32_1 = arith.constant 0 : i32
    %c0_i32_2 = arith.constant 0 : i32
    return %c0_i32, %c0_i32_0, %c0_i32_1 : i32, i32, i32
  }
  func.func @transform_6(%arg0: i32) -> (i32, i32, i32) {
    %c0_i32 = arith.constant 0 : i32
    %c0_i32_0 = arith.constant 0 : i32
    %c0_i32_1 = arith.constant 0 : i32
    return %arg0, %c0_i32, %c0_i32_0 : i32, i32, i32
  }
}

</mosaic_0001>

<bundles_post_ra>
// kernel: clip_encoder.1
= control target key start
LH: loop header
LB: loop body
LE: loop exit
PB: predicated region body
PF: predicated region fallthrough
CT: control target
= control target key end

     0   :  { %11 = vsyncpa [#allocation3], 0  ;;  %s5013_s0 = inlined_call_operand.hbm [shape: f32[2,8,32], index: 0, kind: input, shape index: {}]   ;;  %s5014_s1 = inlined_call_operand.vmem [shape: f32[2,32,96], index: 1, kind: input, shape index: {}]   ;;  %s5015_s2 = inlined_call_operand.vmem [shape: f32[2,32,32], index: 2, kind: input, shape index: {}]   ;;  %s5016_s3 = inlined_call_operand.vmem [shape: f32[2,32,64], index: 3, kind: input, shape index: {}]   ;;  %s5017_s4 = inlined_call_operand.vmem [shape: f32[2,64,32], index: 4, kind: input, shape index: {}]   ;;  %s5018_s5 = inlined_call_operand.vmem [shape: f32[2,3,128], index: 5, kind: input, shape index: {}]   ;;  %s5019_s6 = inlined_call_operand.hbm [shape: f32[2,8,32], index: 6, kind: output, shape index: {}]  }
   0x1   :  { %13 = vsyncpa [#allocation3 + $0x1], 0 }
   0x2   :  { %14 = vsyncpa [#allocation4], 0 }
   0x3   :  { %16 = vsyncpa [#allocation4 + $0x1], 0  ;;  %s4258_s21 = smov 0   ;;  %s4260_s22 = smov 0  }
   0x4   :  { %s4262_s23 = smov 0   ;;  %s4264_s24 = smov 0  }
   0x5 LB: > { %s4279_s25 = sadd.s32 4294967295, %s4205_s24   ;;  %s3600_s26 = sadd.s32 4294967294, %s4205_s24   ;;  %s4205_s24 = sphi %s4264_s24, %s5043_s24   ;;  %s4201_s23 = sphi %s4262_s23, %s5042_s23   ;;  %s4197_s22 = sphi %s4260_s22, %s5041_s22   ;;  %s4193_s21 = sphi %s4258_s21, %s5040_s21  }
   0x6   : > { %s4283_s27 = sadd.s32 1, %s4205_s24   ;;  %s29_s28 = sadd.s32 1, %s4201_s23 }
   0x7   : > { %s26_s29 = ssub.s32 %s4205_s24, %s4283_s27  ;;  %p36_p0 = scmp.ne.s32.totalorder %s4201_s23, %s4197_s22 }
   0x8   : > { %p27_p1 = scmp.eq.s32.totalorder %s26_s29, 0  ;;  %p37_p2 = scmp.eq.s32.totalorder %s4205_s24, 0 }
   0x9   : > { %p42_p3 = scmp.ne.s32.totalorder %s4197_s22, %s4193_s21  ;;  %p43_p4 = scmp.eq.s32.totalorder %s4279_s25, 0 }
   0xa   : > { %s4295_s30 = scalar_select %p27_p1, %s4201_s23, %s29_s28  }
   0xb   : > { %p4297_p5 = por %p37_p2, %p36_p0  ;;  %p4301_p6 = por %p43_p4, %p42_p3 }
   0xc   : > { %p171_p7 = scmp.eq.s32.totalorder %s4279_s25, 1  ;;  %p177_p8 = scmp.eq.s32.totalorder %s3600_s26, 1 }
   0xd   : > { %p4017_p10 = scmp.lt.s32.totalorder %s4205_s24, 2  ;;  %s212_s11 = sand.u32 1, %s4201_s23  }
   0xe   : > { %p4308_p11 = por %p171_p7, %p36_p0  ;;  %p4312_p12 = por %p177_p8, %p42_p3 }
   0xf   : > { %s3604_s12 = sshll.u32 %s4205_s24, 7  ;;  %s3603_s13 = sshll.u32 %s212_s11, 3 }
  0x10   : > { %s5028_s9 = scalar_select %p4308_p11, 1, 0 }
  0x11   : > { %s5029_s10 = scalar_select %p4312_p12, 1, 0 }
  0x12   : > { %s4321_s16 = scalar_lea.hbm %s5013_s0, %s3604_s12  ;;  %s216_s17 = scalar_lea.vmem [#allocation2], %s3603_s13 }
  0x13   : > { %s223_s18 = sshll.u32 %s216_s17, 4  ;;  %p4325_p13 = pnand %p4017_p10, %p4297_p5  ;;  %s4329_s18 = int_to_ptr.vmem [resolvable:$true] %s223_s18 }
  0x14   : > { %s213_s20 = scalar_lea.sflag [#allocation3], %s212_s11  ;;  %s4109_s26 = scalar_lea.hbm %s4321_s16, 128 }
  0x15   : > { %p4110_p2 = scmp.ne.s32.totalorder %s4321_s16, %s4109_s26  ;;  %p4111_p3 = pneg %p4325_p13 }
  0x16   : > { %s4114_s7 = scalar_lea.hbm %s5013_s0, 256  ;;  %p4115_p5 = scmp.lt.u32.totalorder %s4321_s16, %s5013_s0 }
  0x17   : > { %p4112_p4 = pnand %p4111_p3, %p4110_p2  ;;  %p4116_p8 = scmp.lt.u32.totalorder %s4114_s7, %s4109_s26 }
  0x18   : > { %p4118_p9 = scmp.lt.u32.totalorder %s4109_s26, %s4321_s16 }
  0x19   : > { %p4113_p7 = pneg %p4112_p4  ;;  %p4117_p10 = por %p4116_p8, %p4115_p5 }
  0x1b   : > { %p4119_p0 = por %p4118_p9, %p4117_p10 }
  0x1d   : > { %p4120_p1 = pnand %p4119_p0, %p4113_p7 }
  0x1f   : > { %4123 = shalt.err (!%p4120_p1)
}
  0x20   : > { %s4124_s11 = scalar_lea.vmem %s4329_s18, 128  ;;  %s4207_s14 = smov [#allocation2]  }
  0x21   : > { %p4125_p2 = scmp.ne.s32.totalorder %s4329_s18, %s4124_s11  ;;  %s4129_s15 = sshll.u32 %s4207_s14, 4  ;;  %s4130_s15 = int_to_ptr.vmem [resolvable:$false] %s4129_s15 }
  0x22   : > { %s4131_s17 = scalar_lea.vmem %s4130_s15, 256  ;;  %p4132_p11 = scmp.lt.s32.totalorder %s4329_s18, %s4130_s15 }
  0x23   : > { %p4127_p4 = pnand %p4125_p2, %p4111_p3  ;;  %p4133_p5 = scmp.lt.s32.totalorder %s4131_s17, %s4124_s11 }
  0x25   : > { %p4128_p12 = pneg %p4127_p4  ;;  %p4134_p8 = por %p4133_p5, %p4132_p11 }
  0x27   : > { %p4135_p9 = pnand %p4134_p8, %p4128_p12 }
  0x29   : > { %4138 = shalt.err (!%p4135_p9)
}
  0x2a   : > { %4012 = dma.hbm_to_vmem [thread:$0]  (!%p4325_p13), %s4321_s16, 128, %s4329_s18, %s213_s20  }
  0x2b   : > { %p5031_p0 = scmp.lt.s32.totalorder %s4205_s24, 3  ;;  %p5032_p1 = scmp.ge.s32.totalorder %s4205_s24, 1 }
  0x2d   : > { %p229_p3 = pnand %p5032_p1, %p5031_p0 }
  0x2e   : > { %s4363_s26 = sand.u32 (!%p229_p3), 1, %s4197_s22  }
  0x2f   : > { %232 = sbr.rel (%p229_p3) target bundleno = 5404 (0x151c), region = 44  ;;  %s5021_s28 = sshll.u32 (!%p229_p3), %s4363_s26, 3 }
  0x30   : > { %s235_s29 = scalar_lea.sflag (!%p229_p3), [#allocation3], %s4363_s26  ;;  %s238_s19 = scalar_lea.vmem (!%p229_p3), [#allocation2], %s5021_s28 }
  0x36   : > { %4184 = dma.done.wait (%p4301_p6), %s235_s29, 128  }
  0x37   : > { %4186 = vsyncadd (%p4301_p6), %s235_s29, 4294967168  ;;  %vm289_vm0 = vcmask 261120   ;;  %v4373_v0 = vld [vmem:[%s238_s19] sm:$0xff]  ;;  %v304_v2 = vlaneseq  ;;  %s4208_s8 = smov 96   ;;  %v4209_v14 = vmov 0.0|0.0   ;;  %v270_v16 = vld [vmem:[%s5014_s1 + $0x10] sm:$0xff] }
  0x38   : > { %v290_v1 = vsel %vm289_vm0, %v4373_v0, 0.0  ;;  %v4382_v4 = vld [vmem:[%s5018_s5] sm:$0x7]  ;;  %v269_v13 = vld [vmem:[%s5014_s1 + $0x8] sm:$0xff]  ;;  %3945 = vmatprep.subr.bf16.mxu1 %v4209_v14  ;;  %v271_v17 = vld [vmem:[%s5014_s1 + $0x18] sm:$0xff]  ;;  %vm4210_vm1 = vmmov 0  }
  0x39   : > { %291 = vadd.xlane.f32.xlu0 %v290_v1  ;;  %v4377_v3 = vshrl.u32 %v304_v2, 7  ;;  %v268_v12 = vld [vmem:[%s5014_s1] sm:$0xff]  ;;  %v3949_v18 = vpack.c.bf16 %v271_v17, %v270_v16  ;;  %v4211_v19 = vmov 0.0   ;;  %s4212_s29 = smov 112   ;;  %s4213_s19 = smov 120   ;;  %vm833_vm2 = vcmask 64512  }
  0x3a   : > { %v3946_v15 = vpack.c.bf16 %v269_v13, %v268_v12  ;;  %3769 = vmatprep.mubr.msk.f32.mxu1 %vm4210_vm1, %v4211_v19  ;;  %3782 = vmatprep.subr.mxu0 %v4211_v19  ;;  %s4214_s16 = smov 104   ;;  %v4215_v36 = vmov 1983009808   ;;  %v4216_v39 = vmov 1934713408   ;;  %s4217_s18 = smov 64  }
  0x3b   : > { %v306_v5 = vsub.s32 0, %v4377_v3  ;;  %3784 = vmatprep.mubr.msk.f32.mxu0 %vm4210_vm1, %v4211_v19  ;;  %v316_v28 = vsub.s32 1, %v4377_v3  ;;  %v404_v37 = vunpack.c.l.s4 %v4215_v36  ;;  %v436_v40 = vunpack.c.l.s4 %v4216_v39  ;;  %s4218_s20 = smov 16   ;;  %s5025_s7 = smov 8  }
  0x3c   : > { %3947 = vmatpush3.bf16.msra.mxu1 %v3946_v15  ;;  %s5024_s12 = smov 24   ;;  %s5022_s13 = smov 32   ;;  %vm1623_vm3 = vcmask 130048   ;;  %vm1625_vm4 = vcmask 195584   ;;  %vm1817_vm5 = vcmask 523264  }
  0x3d   : > { %v4388_v6 = vrot.slane %v4382_v4, %v306_v5  ;;  %3948 = vmatprep.subr.bf16.mxu1 %v4209_v14  ;;  %v4422_v29 = vrot.slane %v4382_v4, %v316_v28  ;;  %v405_v38 = vunpack.c.0.s8 %v404_v37  ;;  %v437_v47 = vunpack.c.0.s8 %v436_v40  ;;  %s5033_s15 = smov 8   ;;  %s5034_s17 = smov 24  }
  0x3e   : > { %s5035_s28 = smov 32   ;;  %p5037_p11 = scmp.ne.s32.totalorder %s5028_s9, 0 }
  0x3f   : > { %310 = vrot.lane.b32.xlu1 %v4388_v6, %s4208_s8  ;;  %v4452_v44 = vsub.s32 %v405_v38, %v4377_v3  ;;  %v4463_v53 = vsub.s32 %v437_v47, %v4377_v3 }
  0x40   : > { %3950 = vmatpush3.bf16.msra.mxu1 %v3949_v18 }
  0x41   : > { %3772 = vmatprep.subr.mxu1 %v4211_v19 }
  0xb1   : > { %v311_v25 = vpop.permute.xlu1 %310 }
  0xc6   : > { %v292_v7 = vpop.xlane.xlu0 %291 }
  0xc7   : > { %v294_v8 = vmul.f32 0.03125, %v292_v7 }
  0xc9   : > { %v295_v9 = vsub.f32 %v4373_v0, %v294_v8 }
  0xcb   : > { %v296_v10 = vmul.f32 %v295_v9, %v295_v9 }
  0xcd   : > { %v297_v11 = vsel %vm289_vm0, %v296_v10, 0.0 }
  0xce   : > { %298 = vadd.xlane.f32.xlu0 %v297_v11 }
 0x15b   : > { %v299_v20 = vpop.xlane.xlu0 %298 }
 0x15c   : > { %v300_v21 = vmul.f32 0.03125, %v299_v20 }
 0x15e   : > { %v301_v22 = vadd.f32 1e-05, %v300_v21 }
 0x160   : > { %4065 = vrsqrt.f32 %v301_v22 }
 0x16a   : > { %v4066_v23 = vpop.eup %4065 }
 0x16b   : > { %v303_v24 = vmul.f32 %v4066_v23, %v295_v9 }
 0x16d   : > { %v308_v26 = vmul.f32 %v4388_v6, %v303_v24 }
 0x16f   : > { %v313_v27 = vadd.f32 %v311_v25, %v308_v26 }
 0x171   : > { %3770 = vmatmul.mubr.msk.f32.vlgmr.msra.gmra.mrb[0].mxu1 %vm289_vm0, %v313_v27 }
 0x172   : > { %3774 = vmatprep.mubr.msk.f32.mxu1 %vm4210_vm1, %v4211_v19 }
 0x244   : > { %v387_v30 = vpop.f32.mrb[0].mxu1 }
 0x245   : > { %v4425_v31 = vadd.f32 %v387_v30, %v4422_v29  ;;  %v3771_v32 = vpop.f32.mrb[1].mxu1 }
 0x247   : > { %395 = vrot.lane.b32.xlu0 %v4425_v31, %s4212_s29  ;;  %392 = vrot.lane.b32.xlu1 %v4425_v31, %s4213_s19 }
 0x24b   : > { %398 = vrot.lane.b32.xlu1 %v4425_v31, %s4214_s16 }
 0x24f   : > { %537 = vrot.lane.b32.xlu1 %v4425_v31, %s4208_s8 }
 0x2b9   : > { %v4435_v33 = vpop.permute.xlu1 %392  ;;  %v4439_v34 = vpop.permute.xlu0 %395 }
 0x2ba   : > { %539 = vrot.lane.b32.xlu1 %v4435_v33, %s4208_s8  ;;  %v401_v45 = vcombine.low %v4425_v31, %v4439_v34  ;;  %v402_v46 = vcombine.high %v4425_v31, %v4439_v34 }
 0x2bc   : > { %v409_v51 = vrot.slane %v401_v45, %v4452_v44  ;;  %v416_v52 = vrot.slane %v402_v46, %v4452_v44 }
 0x2bd   : > { %v4443_v35 = vpop.permute.xlu1 %398 }
 0x2be   : > { %541 = vrot.lane.b32.xlu1 %v4439_v34, %s4208_s8  ;;  %v417_v41 = vcombine.low %v4435_v33, %v4443_v35  ;;  %v418_v42 = vcombine.high %v4435_v33, %v4443_v35 }
 0x2c0   : > { %v425_v48 = vrot.slane %v417_v41, %v4452_v44  ;;  %v432_v49 = vrot.slane %v418_v42, %v4452_v44 }
 0x2c1   : > { %v538_v43 = vpop.permute.xlu1 %537 }
 0x2c2   : > { %543 = vrot.lane.b32.xlu1 %v4443_v35, %s4208_s8  ;;  %v433_v54 = vcombine.low %v409_v51, %v425_v48  ;;  %v434_v55 = vcombine.high %v409_v51, %v425_v48  ;;  %v449_v56 = vcombine.low %v416_v52, %v432_v49  ;;  %v450_v57 = vcombine.high %v416_v52, %v432_v49 }
 0x2c4   : > { %v441_v61 = vrot.slane %v433_v54, %v4463_v53  ;;  %v448_v62 = vrot.slane %v434_v55, %v4463_v53  ;;  %v457_v63 = vrot.slane %v449_v56, %v4463_v53  ;;  %v464_v1 = vrot.slane %v450_v57, %v4463_v53 }
 0x2c6   : > { %v469_v13 = vcombine.low %v441_v61, %v448_v62  ;;  %v3609_v15 = vcombine.high %v441_v61, %v448_v62  ;;  %v485_v16 = vcombine.low %v457_v63, %v464_v1  ;;  %v3610_v17 = vcombine.high %v457_v63, %v464_v1 }
 0x2c8   : > { %v476_v27 = vrot.slane %v469_v13, %v4452_v44  ;;  %v484_v30 = vrot.slane %v3609_v15, %v4452_v44  ;;  %v492_v32 = vrot.slane %v485_v16, %v4452_v44  ;;  %v500_v36 = vrot.slane %v3610_v17, %v4452_v44 }
 0x2ca   : > { %v501_v46 = vcombine.low %v476_v27, %v484_v30  ;;  %v517_v47 = vcombine.low %v492_v32, %v500_v36  ;;  %v502_v48 = vcombine.high %v476_v27, %v484_v30  ;;  %v518_v49 = vcombine.high %v492_v32, %v500_v36 }
 0x2cc   : > { %v516_v61 = vrot.slane %v502_v48, %v4463_v53  ;;  %v532_v62 = vrot.slane %v518_v49, %v4463_v53 }
 0x32c   : > { %v540_v50 = vpop.permute.xlu1 %539 }
 0x330   : > { %v542_v58 = vpop.permute.xlu1 %541 }
 0x331   : > { %v549_v59 = vcombine.low %v538_v43, %v542_v58  ;;  %v550_v60 = vcombine.high %v538_v43, %v542_v58 }
 0x333   : > { %v557_v9 = vrot.slane %v549_v59, %v4452_v44  ;;  %v564_v10 = vrot.slane %v550_v60, %v4452_v44  ;;  %v509_v59 = vrot.slane %v501_v46, %v4463_v53  ;;  %v525_v60 = vrot.slane %v517_v47, %v4463_v53 }
 0x334   : > { %v544_v2 = vpop.permute.xlu1 %543 }
 0x335   : > { %v565_v7 = vcombine.low %v540_v50, %v544_v2  ;;  %v566_v8 = vcombine.high %v540_v50, %v544_v2  ;;  %v533_v2 = vcombine.low %v509_v59, %v525_v60 }
 0x337   : > { %v573_v11 = vrot.slane %v565_v7, %v4452_v44  ;;  %v580_v12 = vrot.slane %v566_v8, %v4452_v44  ;;  %v535_v7 = vcombine.low %v516_v61, %v532_v62 }
 0x339   : > { %v581_v18 = vcombine.low %v557_v9, %v573_v11  ;;  %v582_v20 = vcombine.high %v557_v9, %v573_v11  ;;  %v597_v21 = vcombine.low %v564_v10, %v580_v12  ;;  %v598_v22 = vcombine.high %v564_v10, %v580_v12 }
 0x33a   : > { %v534_v9 = vcombine.high %v509_v59, %v525_v60  ;;  %v536_v11 = vcombine.high %v516_v61, %v532_v62 }
 0x33b   : > { %v589_v23 = vrot.slane %v581_v18, %v4463_v53  ;;  %v596_v24 = vrot.slane %v582_v20, %v4463_v53  ;;  %v605_v25 = vrot.slane %v597_v21, %v4463_v53  ;;  %v612_v26 = vrot.slane %v598_v22, %v4463_v53 }
 0x33d   : > { %v617_v37 = vcombine.low %v589_v23, %v596_v24  ;;  %v3611_v38 = vcombine.high %v589_v23, %v596_v24  ;;  %v633_v39 = vcombine.low %v605_v25, %v612_v26  ;;  %v3612_v40 = vcombine.high %v605_v25, %v612_v26 }
 0x33f   : > { %v624_v41 = vrot.slane %v617_v37, %v4452_v44  ;;  %v632_v42 = vrot.slane %v3611_v38, %v4452_v44  ;;  %v640_v43 = vrot.slane %v633_v39, %v4452_v44  ;;  %v648_v45 = vrot.slane %v3612_v40, %v4452_v44 }
 0x341   : > { %v649_v50 = vcombine.low %v624_v41, %v632_v42  ;;  %v665_v51 = vcombine.low %v640_v43, %v648_v45  ;;  %v650_v52 = vcombine.high %v624_v41, %v632_v42  ;;  %v666_v54 = vcombine.high %v640_v43, %v648_v45 }
 0x343   : > { %v657_v55 = vrot.slane %v649_v50, %v4463_v53  ;;  %v673_v56 = vrot.slane %v665_v51, %v4463_v53  ;;  %v664_v57 = vrot.slane %v650_v52, %v4463_v53  ;;  %v680_v58 = vrot.slane %v666_v54, %v4463_v53 }
 0x345   : > { %v681_v63 = vcombine.low %v657_v55, %v673_v56  ;;  %v683_v1 = vcombine.low %v664_v57, %v680_v58  ;;  %v682_v8 = vcombine.high %v657_v55, %v673_v56  ;;  %v684_v10 = vcombine.high %v664_v57, %v680_v58 }
 0x347   : > { %3773 = vmatpush3.xpose.msk.msra.mxu1 %vm833_vm2, %v681_v63  ;;  %3783 = vmatpush3.xpose.msk.msra.mxu0 %vm833_vm2, %v683_v1 }
 0x348   : > { %3777 = vmatprep.subr.mxu1 %v4211_v19  ;;  %3792 = vmatprep.subr.mxu0 %v4211_v19 }
 0x34a   : > { %3775 = vmatmul.mubr.msk.f32.vlgmr.msra.gmra.mrb[2].mxu1 %vm833_vm2, %v533_v2  ;;  %3785 = vmatmul.mubr.msk.f32.vlgmr.msra.gmra.mrb[0].mxu0 %vm833_vm2, %v535_v7 }
 0x34b   : > { %3778 = vmatpush3.xpose.msk.msra.mxu1 %vm833_vm2, %v682_v8  ;;  %3779 = vmatprep.mubr.msk.f32.mxu1 %vm4210_vm1, %v4211_v19 }
 0x34c   : > { %3787 = vmatprep.subr.mxu1 %v4211_v19  ;;  %3794 = vmatprep.mubr.msk.f32.mxu0 %vm4210_vm1, %v4211_v19 }
 0x34e   : > { %3780 = vmatmul.mubr.msk.f32.vlgmr.msra.gmra.mrb[4].mxu1 %vm833_vm2, %v534_v9 }
 0x34f   : > { %3788 = vmatpush3.xpose.msk.msra.mxu1 %vm833_vm2, %v684_v10  ;;  %3789 = vmatprep.mubr.msk.f32.mxu1 %vm4210_vm1, %v4211_v19 }
 0x350   : > { %3797 = vmatprep.subr.mxu1 %v4211_v19 }
 0x352   : > { %3790 = vmatmul.mubr.msk.f32.vlgmr.msra.gmra.mrb[6].mxu1 %vm833_vm2, %v536_v11 }
 0x353   : > { %3799 = vmatprep.mubr.msk.f32.mxu1 %vm4210_vm1, %v4211_v19 }
 0x41d   : > { %v906_v12 = vpop.f32.mrb[2].mxu1  ;;  %v1058_v13 = vpop.f32.mrb[0].mxu0 }
 0x41e   : > { %v3776_v15 = vpop.f32.mrb[3].mxu1  ;;  %v3786_v16 = vpop.f32.mrb[1].mxu0  ;;  %v1138_v17 = vsel %vm833_vm2, %v906_v12, -inf  ;;  %v1144_v24 = vsel %vm833_vm2, %v1058_v13, -inf }
 0x41f   : > { %1139 = vmax.xlane.f32.xlu1 %v1138_v17 }
 0x421   : > { %v982_v18 = vpop.f32.mrb[4].mxu1 }
 0x422   : > { %v3781_v20 = vpop.f32.mrb[5].mxu1  ;;  %v1141_v21 = vsel %vm833_vm2, %v982_v18, -inf }
 0x423   : > { %1142 = vmax.xlane.f32.xlu0 %v1141_v21 }
 0x425   : > { %v1134_v22 = vpop.f32.mrb[6].mxu1 }
 0x426   : > { %v3791_v23 = vpop.f32.mrb[7].mxu1  ;;  %v1147_v25 = vsel %vm833_vm2, %v1134_v22, -inf }
 0x427   : > { %1145 = vmax.xlane.f32.xlu0 %v1144_v24  ;;  %1148 = vmax.xlane.f32.xlu1 %v1147_v25 }
 0x438   : > { %687 = vrot.lane.b32.xlu1 %v4435_v33, %s4217_s18 }
 0x43d   : > { %685 = vrot.lane.b32.xlu0 %v4425_v31, %s4217_s18 }
 0x4ac   : > { %v1140_v26 = vpop.xlane.xlu1 %1139 }
 0x4ad   : > { %v1150_v27 = vsub.f32 %v906_v12, %v1140_v26 }
 0x4af   : > { %v1154_v30 = vmul.f32 1.442695, %v1150_v27 }
 0x4b0   : > { %v1143_v32 = vpop.xlane.xlu0 %1142 }
 0x4b1   : > { %4067 = vpow2.f32 %v1154_v30  ;;  %v1151_v36 = vsub.f32 %v982_v18, %v1143_v32 }
 0x4b3   : > { %v1156_v37 = vmul.f32 1.442695, %v1151_v36 }
 0x4b4   : > { %v1146_v38 = vpop.xlane.xlu0 %1145  ;;  %v1149_v39 = vpop.xlane.xlu1 %1148 }
 0x4b5   : > { %4069 = vpow2.f32 %v1156_v37  ;;  %v1152_v40 = vsub.f32 %v1058_v13, %v1146_v38  ;;  %v1153_v41 = vsub.f32 %v1134_v22, %v1149_v39 }
 0x4b7   : > { %v1158_v42 = vmul.f32 1.442695, %v1152_v40  ;;  %v1160_v43 = vmul.f32 1.442695, %v1153_v41 }
 0x4b8   : > { %v686_v51 = vpop.permute.xlu0 %685  ;;  %v688_v52 = vpop.permute.xlu1 %687 }
 0x4b9   : > { %4071 = vpow2.f32 %v1158_v42 }
 0x4ba   : > { %4073 = vpow2.f32 %v1160_v43 }
 0x4bb   : > { %v4521_v33 = vpop.eup %4067 }
 0x4bc   : > { %v1162_v31 = vsel %vm833_vm2, %v4521_v33, 0.0 }
 0x4bd   : > { %1163 = vadd.xlane.f32.xlu0 %v1162_v31 }
 0x4bf   : > { %v4070_v45 = vpop.eup %4069 }
 0x4c0   : > { %v1165_v46 = vsel %vm833_vm2, %v4070_v45, 0.0 }
 0x4c1   : > { %1166 = vadd.xlane.f32.xlu1 %v1165_v46 }
 0x4c3   : > { %v4526_v47 = vpop.eup %4071 }
 0x4c4   : > { %v4528_v48 = vpop.eup %4073  ;;  %v1168_v49 = vsel %vm833_vm2, %v4526_v47, 0.0 }
 0x4c5   : > { %1169 = vadd.xlane.f32.xlu0 %v1168_v49  ;;  %v1171_v50 = vsel %vm833_vm2, %v4528_v48, 0.0 }
 0x4c6   : > { %1172 = vadd.xlane.f32.xlu1 %v1171_v50 }
 0x4d7   : > { %689 = vrot.lane.b32.xlu1 %v4439_v34, %s4217_s18 }
 0x4db   : > { %691 = vrot.lane.b32.xlu0 %v4443_v35, %s4217_s18 }
 0x54a   : > { %v1164_v54 = vpop.xlane.xlu0 %1163 }
 0x54b   : > { %4075 = vrcp.f32 %v1164_v54 }
 0x54e   : > { %v1167_v55 = vpop.xlane.xlu1 %1166 }
 0x54f   : > { %4077 = vrcp.f32 %v1167_v55 }
 0x552   : > { %v1170_v56 = vpop.xlane.xlu0 %1169 }
 0x553   : > { %v1173_v57 = vpop.xlane.xlu1 %1172  ;;  %4079 = vrcp.f32 %v1170_v56 }
 0x554   : > { %4081 = vrcp.f32 %v1173_v57 }
 0x555   : > { %v4076_v27 = vpop.eup %4075 }
 0x556   : > { %v692_v58 = vpop.permute.xlu0 %691  ;;  %v1175_v31 = vmul.f32 %v4076_v27, %v4521_v33  ;;  %v272_v33 = vld [vmem:[%s5015_s2] sm:$0xff] }
 0x557   : > { %v713_v59 = vcombine.low %v688_v52, %v692_v58  ;;  %v714_v60 = vcombine.high %v688_v52, %v692_v58  ;;  %v690_v61 = vpop.permute.xlu1 %689 }
 0x558   : > { %v697_v62 = vcombine.low %v686_v51, %v690_v61  ;;  %v698_v63 = vcombine.high %v686_v51, %v690_v61 }
 0x559   : > { %v721_v1 = vrot.slane %v713_v59, %v4452_v44  ;;  %v728_v2 = vrot.slane %v714_v60, %v4452_v44  ;;  %v4078_v37 = vpop.eup %4077 }
 0x55a   : > { %v705_v34 = vrot.slane %v697_v62, %v4452_v44  ;;  %v712_v35 = vrot.slane %v698_v63, %v4452_v44  ;;  %v1177_v46 = vmul.f32 %v4078_v37, %v4070_v45  ;;  %v273_v45 = vld [vmem:[%s5015_s2 + $0x8] sm:$0xff] }
 0x55c   : > { %v729_v7 = vcombine.low %v705_v34, %v721_v1  ;;  %v730_v8 = vcombine.high %v705_v34, %v721_v1  ;;  %v745_v9 = vcombine.low %v712_v35, %v728_v2  ;;  %v746_v10 = vcombine.high %v712_v35, %v728_v2 }
 0x55d   : > { %v4080_v43 = vpop.eup %4079 }
 0x55e   : > { %v737_v11 = vrot.slane %v729_v7, %v4463_v53  ;;  %v744_v12 = vrot.slane %v730_v8, %v4463_v53  ;;  %v753_v13 = vrot.slane %v745_v9, %v4463_v53  ;;  %v760_v15 = vrot.slane %v746_v10, %v4463_v53  ;;  %v4082_v49 = vpop.eup %4081 }
 0x55f   : > { %v1179_v52 = vmul.f32 %v4080_v43, %v4526_v47  ;;  %v1181_v54 = vmul.f32 %v4082_v49, %v4528_v48  ;;  %v3952_v47 = vpack.c.bf16 %v273_v45, %v272_v33 }
 0x560   : > { %v765_v16 = vcombine.low %v737_v11, %v744_v12  ;;  %v3613_v17 = vcombine.high %v737_v11, %v744_v12  ;;  %v781_v18 = vcombine.low %v753_v13, %v760_v15  ;;  %v3614_v20 = vcombine.high %v753_v13, %v760_v15  ;;  %v274_v13 = vld [vmem:[%s5015_s2 + $0x10] sm:$0xff]  ;;  %v275_v15 = vld [vmem:[%s5015_s2 + $0x18] sm:$0xff] }
 0x562   : > { %v772_v21 = vrot.slane %v765_v16, %v4452_v44  ;;  %v780_v22 = vrot.slane %v3613_v17, %v4452_v44  ;;  %v788_v23 = vrot.slane %v781_v18, %v4452_v44  ;;  %v796_v24 = vrot.slane %v3614_v20, %v4452_v44 }
 0x564   : > { %v797_v25 = vcombine.low %v772_v21, %v780_v22  ;;  %v798_v26 = vcombine.high %v772_v21, %v780_v22  ;;  %v813_v30 = vcombine.low %v788_v23, %v796_v24  ;;  %v814_v32 = vcombine.high %v788_v23, %v796_v24 }
 0x565   : > { %v3955_v21 = vpack.c.bf16 %v275_v15, %v274_v13 }
 0x566   : > { %v805_v36 = vrot.slane %v797_v25, %v4463_v53  ;;  %v821_v38 = vrot.slane %v813_v30, %v4463_v53  ;;  %v812_v39 = vrot.slane %v798_v26, %v4463_v53  ;;  %v828_v40 = vrot.slane %v814_v32, %v4463_v53 }
 0x568   : > { %v829_v41 = vcombine.low %v805_v36, %v821_v38  ;;  %v830_v42 = vcombine.high %v805_v36, %v821_v38  ;;  %v831_v50 = vcombine.low %v812_v39, %v828_v40  ;;  %v832_v51 = vcombine.high %v812_v39, %v828_v40 }
 0x56a   : > { %3793 = vmatpush3.msra.mxu0 %v829_v41  ;;  %3798 = vmatpush3.msra.mxu1 %v830_v42 }
 0x56b   : > { %3795 = vmatmul.mubr.msk.f32.vlgmr.msra.gmra.mrb[2].mxu0 %vm833_vm2, %v1175_v31  ;;  %3800 = vmatmul.mubr.msk.f32.vlgmr.msra.gmra.mrb[8].mxu1 %vm833_vm2, %v1177_v46 }
 0x56c   : > { %3802 = vmatprep.subr.mxu0 %v4211_v19  ;;  %3807 = vmatprep.subr.mxu1 %v4211_v19 }
 0x56d   : > { %3803 = vmatpush3.msra.mxu0 %v831_v50  ;;  %3808 = vmatpush3.msra.mxu1 %v832_v51 }
 0x56e   : > { %3804 = vmatprep.mubr.msk.f32.mxu0 %vm4210_vm1, %v4211_v19  ;;  %3809 = vmatprep.mubr.msk.f32.mxu1 %vm4210_vm1, %v4211_v19 }
 0x56f   : > { %3805 = vmatmul.mubr.msk.f32.vlgmr.msra.gmra.mrb[4].mxu0 %vm833_vm2, %v1179_v52  ;;  %3810 = vmatmul.mubr.msk.f32.vlgmr.msra.gmra.mrb[10].mxu1 %vm833_vm2, %v1181_v54 }
 0x570   : > { %3951 = vmatprep.subr.bf16.mxu0 %v4209_v14  ;;  %3820 = vmatprep.mubr.msk.f32.mxu0 %vm4210_vm1, %v4211_v19 }
 0x571   : > { %3957 = vmatprep.subr.bf16.mxu1 %v4209_v14  ;;  %3831 = vmatprep.mubr.msk.f32.mxu1 %vm4210_vm1, %v4211_v19 }
 0x572   : > { %3953 = vmatpush3.bf16.msra.mxu0 %v3952_v47 }
 0x573   : > { %3954 = vmatprep.subr.bf16.mxu0 %v4209_v14 }
 0x576   : > { %3956 = vmatpush3.bf16.msra.mxu0 %v3955_v21 }
 0x577   : > { %3963 = vmatprep.subr.bf16.mxu0 %v4209_v14 }
 0x63e   : > { %v1251_v48 = vpop.f32.mrb[2].mxu0  ;;  %v1324_v55 = vpop.f32.mrb[8].mxu1 }
 0x63f   : > { %v3796_v56 = vpop.f32.mrb[3].mxu0  ;;  %v3801_v57 = vpop.f32.mrb[9].mxu1 }
 0x642   : > { %v1397_v58 = vpop.f32.mrb[4].mxu0  ;;  %v1470_v59 = vpop.f32.mrb[10].mxu1 }
 0x643   : > { %v1474_v60 = vcombine.low %v1251_v48, %v1397_v58  ;;  %v1475_v61 = vcombine.high %v1251_v48, %v1397_v58  ;;  %v1490_v62 = vcombine.low %v1324_v55, %v1470_v59  ;;  %v1491_v63 = vcombine.high %v1324_v55, %v1470_v59  ;;  %v3806_v1 = vpop.f32.mrb[5].mxu0  ;;  %v3811_v2 = vpop.f32.mrb[11].mxu1 }
 0x644   : > { %v277_v1 = vld [vmem:[%s5016_s3 + $0x8] sm:$0xff] }
 0x645   : > { %v1482_v34 = vrot.slane %v1474_v60, %v4452_v44  ;;  %v1489_v35 = vrot.slane %v1475_v61, %v4452_v44  ;;  %v1498_v7 = vrot.slane %v1490_v62, %v4452_v44  ;;  %v1505_v8 = vrot.slane %v1491_v63, %v4452_v44 }
 0x647   : > { %v1506_v9 = vcombine.low %v1482_v34, %v1498_v7  ;;  %v1507_v10 = vcombine.high %v1482_v34, %v1498_v7  ;;  %v1522_v11 = vcombine.low %v1489_v35, %v1505_v8  ;;  %v1523_v12 = vcombine.high %v1489_v35, %v1505_v8  ;;  %v278_v34 = vld [vmem:[%s5016_s3 + $0x10] sm:$0xff]  ;;  %v279_v35 = vld [vmem:[%s5016_s3 + $0x18] sm:$0xff] }
 0x648   : > { %v3961_v7 = vpack.c.bf16 %v279_v35, %v278_v34  ;;  %v1729_v8 = vsub.s32 2, %v4377_v3  ;;  %v3644_v3 = vld [vmem:[%s5017_s4 + $0x40] sm:$0xff] }
 0x649   : > { %v1514_v16 = vrot.slane %v1506_v9, %v4463_v53  ;;  %v1521_v17 = vrot.slane %v1507_v10, %v4463_v53  ;;  %v1530_v18 = vrot.slane %v1522_v11, %v4463_v53  ;;  %v1537_v20 = vrot.slane %v1523_v12, %v4463_v53 }
 0x64b   : > { %v1542_v22 = vcombine.low %v1514_v16, %v1521_v17  ;;  %v3627_v23 = vcombine.high %v1514_v16, %v1521_v17  ;;  %v1558_v24 = vcombine.low %v1530_v18, %v1537_v20  ;;  %v3628_v25 = vcombine.high %v1530_v18, %v1537_v20  ;;  %v281_v20 = vld [vmem:[%s5017_s4 + $0x8] sm:$0xff] }
 0x64d   : > { %v1549_v26 = vrot.slane %v1542_v22, %v4452_v44  ;;  %v1557_v27 = vrot.slane %v3627_v23, %v4452_v44  ;;  %v1565_v30 = vrot.slane %v1558_v24, %v4452_v44  ;;  %v1573_v32 = vrot.slane %v3628_v25, %v4452_v44  ;;  %v282_v22 = vld [vmem:[%s5017_s4 + $0x10] sm:$0xff]  ;;  %v283_v23 = vld [vmem:[%s5017_s4 + $0x18] sm:$0xff]  ;;  %v284_v25 = vld [vmem:[%s5017_s4 + $0x20] sm:$0xff] }
 0x64e   : > { %v3967_v24 = vpack.c.bf16 %v283_v23, %v282_v22 }
 0x64f   : > { %v1575_v36 = vcombine.high %v1549_v26, %v1557_v27  ;;  %v1591_v37 = vcombine.high %v1565_v30, %v1573_v32  ;;  %v1574_v38 = vcombine.low %v1549_v26, %v1557_v27  ;;  %v1590_v39 = vcombine.low %v1565_v30, %v1573_v32  ;;  %v285_v26 = vld [vmem:[%s5017_s4 + $0x28] sm:$0xff]  ;;  %v286_v30 = vld [vmem:[%s5017_s4 + $0x30] sm:$0xff]  ;;  %v287_v32 = vld [vmem:[%s5017_s4 + $0x38] sm:$0xff] }
 0x650   : > { %v3970_v27 = vpack.c.bf16 %v285_v26, %v284_v25 }
 0x651   : > { %v1589_v40 = vrot.slane %v1575_v36, %v4463_v53  ;;  %v1605_v41 = vrot.slane %v1591_v37, %v4463_v53  ;;  %v1582_v42 = vrot.slane %v1574_v38, %v4463_v53  ;;  %v1598_v43 = vrot.slane %v1590_v39, %v4463_v53 }
 0x652   : > { %v3973_v36 = vpack.c.bf16 %v287_v32, %v286_v30 }
 0x653   : > { %v1608_v31 = vcombine.low %v1589_v40, %v1605_v41  ;;  %v1607_v46 = vcombine.high %v1582_v42, %v1598_v43  ;;  %v1609_v49 = vcombine.high %v1589_v40, %v1605_v41  ;;  %v1606_v50 = vcombine.low %v1582_v42, %v1598_v43 }
 0x655   : > { %1615 = vrot.lane.b32.xlu0 %v1608_v31, %s4218_s20  ;;  %1611 = vrot.lane.b32.xlu1 %v1607_v46, %s5025_s7 }
 0x659   : > { %1619 = vrot.lane.b32.xlu1 %v1609_v49, %s5024_s12  ;;  %1702 = vrot.lane.b32.xlu0 %v4422_v29, %s5022_s13 }
 0x6c7   : > { %v1612_v51 = vpop.permute.xlu1 %1611  ;;  %v1616_v52 = vpop.permute.xlu0 %1615 }
 0x6c8   : > { %v1622_v54 = vsel %vm833_vm2, %v1606_v50, %v1612_v51 }
 0x6c9   : > { %v1624_v45 = vsel %vm1623_vm3, %v1622_v54, %v1616_v52 }
 0x6cb   : > { %v1620_v33 = vpop.permute.xlu1 %1619  ;;  %v1703_v55 = vpop.permute.xlu0 %1702 }
 0x6cc   : > { %v1626_v47 = vsel %vm1625_vm4, %v1624_v45, %v1620_v33 }
 0x6cd   : > { %3821 = vmatmul.mubr.msk.f32.vlgmr.msra.gmra.mrb[6].mxu0 %vm289_vm0, %v1626_v47 }
 0x6ce   : > { %3850 = vmatprep.mubr.msk.f32.mxu0 %vm4210_vm1, %v4211_v19 }
 0x7a0   : > { %v1696_v48 = vpop.f32.mrb[6].mxu0 }
 0x7a1   : > { %v1700_v29 = vadd.f32 %v1696_v48, %v4373_v0  ;;  %v3822_v56 = vpop.f32.mrb[7].mxu0  ;;  %v276_v0 = vld [vmem:[%s5016_s3] sm:$0xff] }
 0x7a2   : > { %v3958_v2 = vpack.c.bf16 %v277_v1, %v276_v0  ;;  %v3635_v0 = vld [vmem:[%s5014_s1 + $0x38] sm:$0xff] }
 0x7a3   : > { %v4615_v57 = vadd.f32 %v1703_v55, %v1700_v29  ;;  %v4686_v55 = vld [vmem:[%s5018_s5 + $0x4] sm:$0x7] }
 0x7a4   : > { %3959 = vmatpush3.bf16.msra.mxu1 %v3958_v2  ;;  %v4691_v29 = vrot.slane %v4686_v55, %v306_v5  ;;  %v3633_v5 = vld [vmem:[%s5014_s1 + $0x28] sm:$0xff] }
 0x7a5   : > { %v1706_v58 = vsel %vm289_vm0, %v4615_v57, 0.0  ;;  %3960 = vmatprep.subr.bf16.mxu1 %v4209_v14 }
 0x7a6   : > { %1707 = vadd.xlane.f32.xlu1 %v1706_v58 }
 0x7a8   : > { %3962 = vmatpush3.bf16.msra.mxu1 %v3961_v7 }
 0x7a9   : > { %3975 = vmatprep.subr.bf16.mxu1 %v4209_v14 }
 0x7b7   : > { %1723 = vrot.lane.b32.xlu1 %v4388_v6, %s5022_s13 }
 0x833   : > { %v1708_v59 = vpop.xlane.xlu1 %1707 }
 0x834   : > { %v1709_v60 = vmul.f32 0.03125, %v1708_v59 }
 0x836   : > { %v1710_v61 = vsub.f32 %v4615_v57, %v1709_v60 }
 0x837   : > { %v1724_v16 = vpop.permute.xlu1 %1723 }
 0x838   : > { %v1711_v62 = vmul.f32 %v1710_v61, %v1710_v61 }
 0x83a   : > { %v1712_v63 = vsel %vm289_vm0, %v1711_v62, 0.0  ;;  %v3634_v62 = vld [vmem:[%s5014_s1 + $0x30] sm:$0xff] }
 0x83b   : > { %1713 = vadd.xlane.f32.xlu0 %v1712_v63  ;;  %v3979_v1 = vpack.c.bf16 %v3635_v0, %v3634_v62 }
 0x851   : > { %1719 = vrot.lane.b32.xlu0 %v4388_v6, %s4217_s18  ;;  %v1730_v6 = vrot.slane %v4382_v4, %v1729_v8  ;;  %v280_v4 = vld [vmem:[%s5017_s4] sm:$0xff] }
 0x852   : > { %v3964_v21 = vpack.c.bf16 %v281_v20, %v280_v4 }
 0x853   : > { %1814 = vrot.lane.b32.xlu1 %v1730_v6, %s4217_s18 }
 0x854   : > { %3965 = vmatpush3.bf16.msra.mxu0 %v3964_v21 }
 0x855   : > { %3966 = vmatprep.subr.bf16.mxu0 %v4209_v14 }
 0x858   : > { %3968 = vmatpush3.bf16.msra.mxu0 %v3967_v24 }
 0x859   : > { %3969 = vmatprep.subr.bf16.mxu0 %v4209_v14 }
 0x85c   : > { %3971 = vmatpush3.bf16.msra.mxu0 %v3970_v27 }
 0x85d   : > { %3972 = vmatprep.subr.bf16.mxu0 %v4209_v14 }
 0x860   : > { %3974 = vmatpush3.bf16.msra.mxu0 %v3973_v36 }
 0x861   : > { %3874 = vmatprep.subr.mxu0 %v4211_v19 }
 0x8c5   : > { %v1815_v52 = vpop.permute.xlu1 %1814 }
 0x8c8   : > { %v1714_v9 = vpop.xlane.xlu0 %1713 }
 0x8c9   : > { %v1715_v10 = vmul.f32 0.03125, %v1714_v9 }
 0x8cb   : > { %v1716_v11 = vadd.f32 1e-05, %v1715_v10 }
 0x8cc   : > { %v1720_v13 = vpop.permute.xlu0 %1719 }
 0x8cd   : > { %4083 = vrsqrt.f32 %v1716_v11 }
 0x8d7   : > { %v4084_v12 = vpop.eup %4083 }
 0x8d8   : > { %v1718_v15 = vmul.f32 %v4084_v12, %v1710_v61  ;;  %v3632_v61 = vld [vmem:[%s5014_s1 + $0x20] sm:$0xff]  ;;  %v4718_v12 = vrot.slane %v4686_v55, %v316_v28 }
 0x8d9   : > { %v3976_v63 = vpack.c.bf16 %v3633_v5, %v3632_v61 }
 0x8da   : > { %v1722_v17 = vmul.f32 %v1720_v13, %v1718_v15 }
 0x8dc   : > { %v1726_v18 = vadd.f32 %v1724_v16, %v1722_v17 }
 0x8de   : > { %3832 = vmatmul.mubr.msk.f32.vlgmr.msra.gmra.mrb[12].mxu1 %vm289_vm0, %v1726_v18 }
 0x8df   : > { %3861 = vmatprep.mubr.msk.f32.mxu1 %vm4210_vm1, %v4211_v19  ;;  %3977 = vmatpush3.bf16.msra.mxu1 %v3976_v63 }
 0x8e0   : > { %3978 = vmatprep.subr.bf16.mxu1 %v4209_v14 }
 0x8e3   : > { %3980 = vmatpush3.bf16.msra.mxu1 %v3979_v1 }
 0x8e4   : > { %3864 = vmatprep.subr.mxu1 %v4211_v19 }
 0x9b1   : > { %v1800_v37 = vpop.f32.mrb[12].mxu1 }
 0x9b2   : > { %v1801_v38 = vadd.f32 %v1800_v37, %v1730_v6  ;;  %v3833_v39 = vpop.f32.mrb[13].mxu1 }
 0x9b4   : > { %v1805_v40 = vmul.f32 %v1801_v38, %v1801_v38  ;;  %v1804_v49 = vmul.f32 0.5, %v1801_v38 }
 0x9b6   : > { %v1806_v41 = vmul.f32 %v1805_v40, %v1801_v38 }
 0x9b8   : > { %v1807_v42 = vmul.f32 0.044715, %v1806_v41 }
 0x9ba   : > { %v1808_v43 = vadd.f32 %v1807_v42, %v1801_v38 }
 0x9bc   : > { %v1809_v31 = vmul.f32 0.7978845, %v1808_v43 }
 0x9be   : > { %4085 = vtanh.f32 %v1809_v31 }
 0x9c8   : > { %v4086_v46 = vpop.eup %4085 }
 0x9c9   : > { %v1811_v50 = vadd.f32 1.0, %v4086_v46 }
 0x9cb   : > { %v1812_v51 = vmul.f32 %v1811_v50, %v1804_v49 }
 0x9cd   : > { %3851 = vmatmul.mubr.msk.f32.vlgmr.msra.gmra.mrb[8].mxu0 %vm1817_vm5, %v1812_v51 }
 0x9ce   : > { %3876 = vmatprep.mubr.msk.f32.mxu0 %vm4210_vm1, %v4211_v19 }
 0xaa0   : > { %v1887_v54 = vpop.f32.mrb[8].mxu0 }
 0xaa1   : > { %v1888_v33 = vadd.f32 %v1887_v54, %v1815_v52  ;;  %v3852_v45 = vpop.f32.mrb[9].mxu0 }
 0xaa3   : > { %v4679_v47 = vadd.f32 %v1888_v33, %v4615_v57 }
 0xaa5   : > { %v1918_v48 = vsel %vm289_vm0, %v4679_v47, 0.0 }
 0xaa6   : > { %1919 = vadd.xlane.f32.xlu0 %v1918_v48 }
 0xabc   : > { %1937 = vrot.lane.b32.xlu0 %v4691_v29, %s4208_s8 }
 0xb33   : > { %v1920_v56 = vpop.xlane.xlu0 %1919 }
 0xb34   : > { %v1921_v57 = vmul.f32 0.03125, %v1920_v56 }
 0xb36   : > { %v1922_v58 = vsub.f32 %v4679_v47, %v1921_v57 }
 0xb37   : > { %v1938_v9 = vpop.permute.xlu0 %1937 }
 0xb38   : > { %v1923_v59 = vmul.f32 %v1922_v58, %v1922_v58 }
 0xb3a   : > { %v1924_v60 = vsel %vm289_vm0, %v1923_v59, 0.0 }
 0xb3b   : > { %1925 = vadd.xlane.f32.xlu1 %v1924_v60 }
 0xbc8   : > { %v1926_v2 = vpop.xlane.xlu1 %1925 }
 0xbc9   : > { %v1927_v34 = vmul.f32 0.03125, %v1926_v2 }
 0xbcb   : > { %v1928_v35 = vadd.f32 1e-05, %v1927_v34 }
 0xbcd   : > { %4087 = vrsqrt.f32 %v1928_v35 }
 0xbd7   : > { %v4088_v7 = vpop.eup %4087 }
 0xbd8   : > { %v1930_v6 = vmul.f32 %v4088_v7, %v1922_v58 }
 0xbda   : > { %v1935_v10 = vmul.f32 %v4691_v29, %v1930_v6 }
 0xbdc   : > { %v1940_v11 = vadd.f32 %v1938_v9, %v1935_v10 }
 0xbde   : > { %3862 = vmatmul.mubr.msk.f32.vlgmr.msra.gmra.mrb[14].mxu1 %vm289_vm0, %v1940_v11 }
 0xbdf   : > { %3866 = vmatprep.mubr.msk.f32.mxu1 %vm4210_vm1, %v4211_v19 }
 0xcb1   : > { %v2014_v13 = vpop.f32.mrb[14].mxu1 }
 0xcb2   : > { %v4721_v15 = vadd.f32 %v2014_v13, %v4718_v12  ;;  %v3863_v16 = vpop.f32.mrb[15].mxu1 }
 0xcb4   : > { %2022 = vrot.lane.b32.xlu0 %v4721_v15, %s4212_s29  ;;  %2019 = vrot.lane.b32.xlu1 %v4721_v15, %s4213_s19  ;;  %s4222_s19 = smov [#allocation5]  }
 0xcb8   : > { %2164 = vrot.lane.b32.xlu0 %v4721_v15, %s4208_s8  ;;  %2025 = vrot.lane.b32.xlu1 %v4721_v15, %s4214_s16  ;;  %s4143_s16 = sshll.u32 %s4222_s19, 4  ;;  %s4144_s16 = int_to_ptr.vmem [resolvable:$false] %s4143_s16 }
 0xcb9   : > { %s4145_s12 = scalar_lea.vmem %s4144_s16, 256 }
 0xd26   : > { %v4731_v17 = vpop.permute.xlu0 %2022  ;;  %v4733_v28 = vpop.permute.xlu1 %2019 }
 0xd27   : > { %2168 = vrot.lane.b32.xlu0 %v4731_v17, %s4208_s8  ;;  %2166 = vrot.lane.b32.xlu1 %v4733_v28, %s4208_s8  ;;  %v2028_v21 = vcombine.low %v4721_v15, %v4731_v17  ;;  %v2029_v22 = vcombine.high %v4721_v15, %v4731_v17 }
 0xd29   : > { %v2036_v26 = vrot.slane %v2028_v21, %v4452_v44  ;;  %v2043_v27 = vrot.slane %v2029_v22, %v4452_v44 }
 0xd2a   : > { %v4739_v18 = vpop.permute.xlu1 %2025  ;;  %v2165_v23 = vpop.permute.xlu0 %2164 }
 0xd2b   : > { %2170 = vrot.lane.b32.xlu1 %v4739_v18, %s4208_s8  ;;  %v2044_v4 = vcombine.low %v4733_v28, %v4739_v18  ;;  %v2045_v20 = vcombine.high %v4733_v28, %v4739_v18 }
 0xd2d   : > { %v2052_v24 = vrot.slane %v2044_v4, %v4452_v44  ;;  %v2059_v25 = vrot.slane %v2045_v20, %v4452_v44 }
 0xd2f   : > { %v2060_v30 = vcombine.low %v2036_v26, %v2052_v24  ;;  %v2061_v32 = vcombine.high %v2036_v26, %v2052_v24  ;;  %v2076_v36 = vcombine.low %v2043_v27, %v2059_v25  ;;  %v2077_v37 = vcombine.high %v2043_v27, %v2059_v25 }
 0xd31   : > { %v2068_v42 = vrot.slane %v2060_v30, %v4463_v53  ;;  %v2075_v43 = vrot.slane %v2061_v32, %v4463_v53  ;;  %v2084_v31 = vrot.slane %v2076_v36, %v4463_v53  ;;  %v2091_v46 = vrot.slane %v2077_v37, %v4463_v53 }
 0xd33   : > { %v2096_v48 = vcombine.low %v2068_v42, %v2075_v43  ;;  %v3654_v56 = vcombine.high %v2068_v42, %v2075_v43  ;;  %v2112_v57 = vcombine.low %v2084_v31, %v2091_v46  ;;  %v3655_v58 = vcombine.high %v2084_v31, %v2091_v46 }
 0xd35   : > { %v2103_v2 = vrot.slane %v2096_v48, %v4452_v44  ;;  %v2111_v34 = vrot.slane %v3654_v56, %v4452_v44  ;;  %v2119_v35 = vrot.slane %v2112_v57, %v4452_v44  ;;  %v2127_v7 = vrot.slane %v3655_v58, %v4452_v44 }
 0xd37   : > { %v2128_v21 = vcombine.low %v2103_v2, %v2111_v34  ;;  %v2144_v22 = vcombine.low %v2119_v35, %v2127_v7  ;;  %v2145_v24 = vcombine.high %v2119_v35, %v2127_v7 }
 0xd39   : > { %v2159_v42 = vrot.slane %v2145_v24, %v4463_v53 }
 0xd99   : > { %v2169_v38 = vpop.permute.xlu0 %2168  ;;  %v2167_v39 = vpop.permute.xlu1 %2166 }
 0xd9a   : > { %v2176_v40 = vcombine.low %v2165_v23, %v2169_v38  ;;  %v2177_v41 = vcombine.high %v2165_v23, %v2169_v38  ;;  %v2129_v23 = vcombine.high %v2103_v2, %v2111_v34 }
 0xd9c   : > { %v2184_v52 = vrot.slane %v2176_v40, %v4452_v44  ;;  %v2191_v54 = vrot.slane %v2177_v41, %v4452_v44  ;;  %v2152_v40 = vrot.slane %v2144_v22, %v4463_v53  ;;  %v2143_v41 = vrot.slane %v2129_v23, %v4463_v53 }
 0xd9d   : > { %v2171_v49 = vpop.permute.xlu1 %2170 }
 0xd9e   : > { %v2192_v50 = vcombine.low %v2167_v39, %v2171_v49  ;;  %v2193_v51 = vcombine.high %v2167_v39, %v2171_v49  ;;  %v2136_v39 = vrot.slane %v2128_v21, %v4463_v53  ;;  %v2162_v49 = vcombine.low %v2143_v41, %v2159_v42 }
 0xda0   : > { %v2200_v33 = vrot.slane %v2192_v50, %v4452_v44  ;;  %v2207_v45 = vrot.slane %v2193_v51, %v4452_v44  ;;  %v2160_v46 = vcombine.low %v2136_v39, %v2152_v40  ;;  %v2161_v51 = vcombine.high %v2136_v39, %v2152_v40 }
 0xda2   : > { %v2208_v59 = vcombine.low %v2184_v52, %v2200_v33  ;;  %v2209_v60 = vcombine.high %v2184_v52, %v2200_v33  ;;  %v2224_v61 = vcombine.low %v2191_v54, %v2207_v45  ;;  %v2225_v5 = vcombine.high %v2191_v54, %v2207_v45 }
 0xda3   : > { %v2163_v54 = vcombine.high %v2143_v41, %v2159_v42 }
 0xda4   : > { %v2216_v62 = vrot.slane %v2208_v59, %v4463_v53  ;;  %v2223_v63 = vrot.slane %v2209_v60, %v4463_v53  ;;  %v2232_v0 = vrot.slane %v2224_v61, %v4463_v53  ;;  %v2239_v1 = vrot.slane %v2225_v5, %v4463_v53 }
 0xda6   : > { %v2244_v6 = vcombine.low %v2216_v62, %v2223_v63  ;;  %v3656_v9 = vcombine.high %v2216_v62, %v2223_v63  ;;  %v2260_v10 = vcombine.low %v2232_v0, %v2239_v1  ;;  %v3657_v11 = vcombine.high %v2232_v0, %v2239_v1 }
 0xda8   : > { %v2251_v13 = vrot.slane %v2244_v6, %v4452_v44  ;;  %v2259_v16 = vrot.slane %v3656_v9, %v4452_v44  ;;  %v2267_v4 = vrot.slane %v2260_v10, %v4452_v44  ;;  %v2275_v20 = vrot.slane %v3657_v11, %v4452_v44 }
 0xdaa   : > { %v2276_v25 = vcombine.low %v2251_v13, %v2259_v16  ;;  %v2277_v26 = vcombine.high %v2251_v13, %v2259_v16  ;;  %v2292_v27 = vcombine.low %v2267_v4, %v2275_v20  ;;  %v2293_v30 = vcombine.high %v2267_v4, %v2275_v20 }
 0xdac   : > { %v2284_v32 = vrot.slane %v2276_v25, %v4463_v53  ;;  %v2300_v36 = vrot.slane %v2292_v27, %v4463_v53  ;;  %v2291_v37 = vrot.slane %v2277_v26, %v4463_v53  ;;  %v2307_v38 = vrot.slane %v2293_v30, %v4463_v53 }
 0xdae   : > { %v2308_v43 = vcombine.low %v2284_v32, %v2300_v36  ;;  %v2310_v31 = vcombine.low %v2291_v37, %v2307_v38  ;;  %v2309_v50 = vcombine.high %v2284_v32, %v2300_v36  ;;  %v2311_v52 = vcombine.high %v2291_v37, %v2307_v38 }
 0xdb0   : > { %3865 = vmatpush3.xpose.msk.msra.mxu1 %vm833_vm2, %v2308_v43  ;;  %3875 = vmatpush3.xpose.msk.msra.mxu0 %vm833_vm2, %v2310_v31 }
 0xdb1   : > { %3869 = vmatprep.subr.mxu1 %v4211_v19  ;;  %3884 = vmatprep.subr.mxu0 %v4211_v19 }
 0xdb3   : > { %3867 = vmatmul.mubr.msk.f32.vlgmr.msra.gmra.mrb[16].mxu1 %vm833_vm2, %v2160_v46  ;;  %3877 = vmatmul.mubr.msk.f32.vlgmr.msra.gmra.mrb[10].mxu0 %vm833_vm2, %v2162_v49 }
 0xdb4   : > { %3870 = vmatpush3.xpose.msk.msra.mxu1 %vm833_vm2, %v2309_v50  ;;  %3871 = vmatprep.mubr.msk.f32.mxu1 %vm4210_vm1, %v4211_v19 }
 0xdb5   : > { %3879 = vmatprep.subr.mxu1 %v4211_v19  ;;  %3886 = vmatprep.mubr.msk.f32.mxu0 %vm4210_vm1, %v4211_v19 }
 0xdb7   : > { %3872 = vmatmul.mubr.msk.f32.vlgmr.msra.gmra.mrb[18].mxu1 %vm833_vm2, %v2161_v51 }
 0xdb8   : > { %3880 = vmatpush3.xpose.msk.msra.mxu1 %vm833_vm2, %v2311_v52  ;;  %3881 = vmatprep.mubr.msk.f32.mxu1 %vm4210_vm1, %v4211_v19 }
 0xdb9   : > { %3889 = vmatprep.subr.mxu1 %v4211_v19 }
 0xdbb   : > { %3882 = vmatmul.mubr.msk.f32.vlgmr.msra.gmra.mrb[20].mxu1 %vm833_vm2, %v2163_v54 }
 0xdbc   : > { %3891 = vmatprep.mubr.msk.f32.mxu1 %vm4210_vm1, %v4211_v19 }
 0xe86   : > { %v2532_v33 = vpop.f32.mrb[16].mxu1  ;;  %v2684_v45 = vpop.f32.mrb[10].mxu0 }
 0xe87   : > { %v3868_v48 = vpop.f32.mrb[17].mxu1  ;;  %v3878_v56 = vpop.f32.mrb[11].mxu0  ;;  %v2764_v57 = vsel %vm833_vm2, %v2532_v33, -inf  ;;  %v2770_v60 = vsel %vm833_vm2, %v2684_v45, -inf }
 0xe88   : > { %2765 = vmax.xlane.f32.xlu0 %v2764_v57 }
 0xe8a   : > { %v2608_v58 = vpop.f32.mrb[18].mxu1 }
 0xe8b   : > { %v3873_v59 = vpop.f32.mrb[19].mxu1  ;;  %v2767_v61 = vsel %vm833_vm2, %v2608_v58, -inf }
 0xe8c   : > { %2771 = vmax.xlane.f32.xlu0 %v2770_v60  ;;  %2768 = vmax.xlane.f32.xlu1 %v2767_v61 }
 0xe8e   : > { %v2760_v5 = vpop.f32.mrb[20].mxu1 }
 0xe8f   : > { %v3883_v62 = vpop.f32.mrb[21].mxu1  ;;  %v2773_v63 = vsel %vm833_vm2, %v2760_v5, -inf }
 0xe90   : > { %2774 = vmax.xlane.f32.xlu0 %v2773_v63 }
 0xe9d   : > { %2312 = vrot.lane.b32.xlu1 %v4721_v15, %s4217_s18 }
 0xf15   : > { %v2766_v0 = vpop.xlane.xlu0 %2765 }
 0xf16   : > { %v2776_v1 = vsub.f32 %v2532_v33, %v2766_v0 }
 0xf18   : > { %v2780_v2 = vmul.f32 1.442695, %v2776_v1 }
 0xf19   : > { %v2772_v34 = vpop.xlane.xlu0 %2771  ;;  %v2769_v35 = vpop.xlane.xlu1 %2768 }
 0xf1a   : > { %4089 = vpow2.f32 %v2780_v2  ;;  %v2778_v7 = vsub.f32 %v2684_v45, %v2772_v34  ;;  %v2777_v6 = vsub.f32 %v2608_v58, %v2769_v35 }
 0xf1c   : > { %v2784_v9 = vmul.f32 1.442695, %v2778_v7  ;;  %v2782_v10 = vmul.f32 1.442695, %v2777_v6 }
 0xf1d   : > { %v2775_v11 = vpop.xlane.xlu0 %2774  ;;  %v2313_v26 = vpop.permute.xlu1 %2312 }
 0xf1e   : > { %4091 = vpow2.f32 %v2784_v9  ;;  %v2779_v13 = vsub.f32 %v2760_v5, %v2775_v11 }
 0xf1f   : > { %4093 = vpow2.f32 %v2782_v10 }
 0xf20   : > { %v2786_v16 = vmul.f32 1.442695, %v2779_v13 }
 0xf22   : > { %4095 = vpow2.f32 %v2786_v16 }
 0xf24   : > { %v4809_v4 = vpop.eup %4089 }
 0xf25   : > { %v2788_v15 = vsel %vm833_vm2, %v4809_v4, 0.0 }
 0xf26   : > { %2789 = vadd.xlane.f32.xlu1 %v2788_v15 }
 0xf28   : > { %v4813_v20 = vpop.eup %4091 }
 0xf29   : > { %v4094_v21 = vpop.eup %4093  ;;  %v2794_v22 = vsel %vm833_vm2, %v4813_v20, 0.0 }
 0xf2a   : > { %2795 = vadd.xlane.f32.xlu1 %v2794_v22  ;;  %v2791_v23 = vsel %vm833_vm2, %v4094_v21, 0.0 }
 0xf2b   : > { %2792 = vadd.xlane.f32.xlu0 %v2791_v23 }
 0xf2c   : > { %v4818_v24 = vpop.eup %4095 }
 0xf2d   : > { %v2797_v25 = vsel %vm833_vm2, %v4818_v24, 0.0 }
 0xf2f   : > { %2798 = vadd.xlane.f32.xlu0 %v2797_v25 }
 0xf3b   : > { %2316 = vrot.lane.b32.xlu1 %v4731_v17, %s4217_s18 }
 0xf3f   : > { %2318 = vrot.lane.b32.xlu1 %v4739_v18, %s4217_s18 }
 0xf45   : > { %2314 = vrot.lane.b32.xlu0 %v4733_v28, %s4217_s18 }
 0xfb3   : > { %v2790_v27 = vpop.xlane.xlu1 %2789 }
 0xfb4   : > { %4097 = vrcp.f32 %v2790_v27 }
 0xfb7   : > { %v2796_v30 = vpop.xlane.xlu1 %2795 }
 0xfb8   : > { %v2793_v32 = vpop.xlane.xlu0 %2792 }
 0xfb9   : > { %4099 = vrcp.f32 %v2793_v32 }
 0xfba   : > { %4101 = vrcp.f32 %v2796_v30 }
 0xfbb   : > { %v2317_v36 = vpop.permute.xlu1 %2316 }
 0xfbc   : > { %v2799_v37 = vpop.xlane.xlu0 %2798  ;;  %v2324_v38 = vcombine.low %v2313_v26, %v2317_v36  ;;  %v2325_v39 = vcombine.high %v2313_v26, %v2317_v36 }
 0xfbd   : > { %4103 = vrcp.f32 %v2799_v37 }
 0xfbe   : > { %v2332_v17 = vrot.slane %v2324_v38, %v4452_v44  ;;  %v2339_v18 = vrot.slane %v2325_v39, %v4452_v44  ;;  %v4098_v62 = vpop.eup %4097 }
 0xfbf   : > { %v2319_v40 = vpop.permute.xlu1 %2318  ;;  %v2801_v15 = vmul.f32 %v4098_v62, %v4809_v4  ;;  %v3636_v4 = vld [vmem:[%s5015_s2 + $0x20] sm:$0xff] }
 0xfc0   : > { %v2315_v41 = vpop.permute.xlu0 %2314 }
 0xfc1   : > { %v2340_v42 = vcombine.low %v2315_v41, %v2319_v40  ;;  %v2341_v43 = vcombine.high %v2315_v41, %v2319_v40 }
 0xfc3   : > { %v2348_v31 = vrot.slane %v2340_v42, %v4452_v44  ;;  %v2355_v28 = vrot.slane %v2341_v43, %v4452_v44  ;;  %v4100_v34 = vpop.eup %4099 }
 0xfc4   : > { %v4102_v6 = vpop.eup %4101  ;;  %v2803_v22 = vmul.f32 %v4100_v34, %v4094_v21 }
 0xfc5   : > { %v2356_v46 = vcombine.low %v2332_v17, %v2348_v31  ;;  %v2357_v49 = vcombine.high %v2332_v17, %v2348_v31  ;;  %v2372_v50 = vcombine.low %v2339_v18, %v2355_v28  ;;  %v2373_v51 = vcombine.high %v2339_v18, %v2355_v28 }
 0xfc6   : > { %v2805_v26 = vmul.f32 %v4102_v6, %v4813_v20  ;;  %v3637_v20 = vld [vmem:[%s5015_s2 + $0x28] sm:$0xff] }
 0xfc7   : > { %v2364_v52 = vrot.slane %v2356_v46, %v4463_v53  ;;  %v2371_v54 = vrot.slane %v2357_v49, %v4463_v53  ;;  %v2380_v33 = vrot.slane %v2372_v50, %v4463_v53  ;;  %v2387_v45 = vrot.slane %v2373_v51, %v4463_v53  ;;  %v4104_v16 = vpop.eup %4103 }
 0xfc8   : > { %v2807_v27 = vmul.f32 %v4104_v16, %v4818_v24  ;;  %v3982_v21 = vpack.c.bf16 %v3637_v20, %v3636_v4 }
 0xfc9   : > { %v2392_v48 = vcombine.low %v2364_v52, %v2371_v54  ;;  %v3658_v56 = vcombine.high %v2364_v52, %v2371_v54  ;;  %v2408_v57 = vcombine.low %v2380_v33, %v2387_v45  ;;  %v3659_v58 = vcombine.high %v2380_v33, %v2387_v45  ;;  %v3638_v54 = vld [vmem:[%s5015_s2 + $0x30] sm:$0xff]  ;;  %v3639_v33 = vld [vmem:[%s5015_s2 + $0x38] sm:$0xff] }
 0xfcb   : > { %v2399_v59 = vrot.slane %v2392_v48, %v4452_v44  ;;  %v2407_v60 = vrot.slane %v3658_v56, %v4452_v44  ;;  %v2415_v61 = vrot.slane %v2408_v57, %v4452_v44  ;;  %v2423_v5 = vrot.slane %v3659_v58, %v4452_v44 }
 0xfcc   : > { %v3985_v58 = vpack.c.bf16 %v3639_v33, %v3638_v54  ;;  %v3646_v54 = vld [vmem:[%s5017_s4 + $0x50] sm:$0xff]  ;;  %v3647_v33 = vld [vmem:[%s5017_s4 + $0x58] sm:$0xff] }
 0xfcd   : > { %v2424_v63 = vcombine.low %v2399_v59, %v2407_v60  ;;  %v2440_v0 = vcombine.low %v2415_v61, %v2423_v5  ;;  %v2425_v1 = vcombine.high %v2399_v59, %v2407_v60  ;;  %v2441_v2 = vcombine.high %v2415_v61, %v2423_v5 }
 0xfcf   : > { %v2432_v35 = vrot.slane %v2424_v63, %v4463_v53  ;;  %v2448_v7 = vrot.slane %v2440_v0, %v4463_v53  ;;  %v2439_v9 = vrot.slane %v2425_v1, %v4463_v53  ;;  %v2455_v10 = vrot.slane %v2441_v2, %v4463_v53 }
 0xfd1   : > { %v2456_v11 = vcombine.low %v2432_v35, %v2448_v7  ;;  %v2457_v13 = vcombine.high %v2432_v35, %v2448_v7  ;;  %v2458_v23 = vcombine.low %v2439_v9, %v2455_v10  ;;  %v2459_v25 = vcombine.high %v2439_v9, %v2455_v10 }
 0xfd3   : > { %3885 = vmatpush3.msra.mxu0 %v2456_v11  ;;  %3890 = vmatpush3.msra.mxu1 %v2457_v13 }
 0xfd4   : > { %3887 = vmatmul.mubr.msk.f32.vlgmr.msra.gmra.mrb[12].mxu0 %vm833_vm2, %v2801_v15  ;;  %3892 = vmatmul.mubr.msk.f32.vlgmr.msra.gmra.mrb[22].mxu1 %vm833_vm2, %v2803_v22 }
 0xfd5   : > { %3894 = vmatprep.subr.mxu0 %v4211_v19  ;;  %3899 = vmatprep.subr.mxu1 %v4211_v19 }
 0xfd6   : > { %3895 = vmatpush3.msra.mxu0 %v2458_v23  ;;  %3900 = vmatpush3.msra.mxu1 %v2459_v25 }
 0xfd7   : > { %3896 = vmatprep.mubr.msk.f32.mxu0 %vm4210_vm1, %v4211_v19  ;;  %3901 = vmatprep.mubr.msk.f32.mxu1 %vm4210_vm1, %v4211_v19 }
 0xfd8   : > { %3897 = vmatmul.mubr.msk.f32.vlgmr.msra.gmra.mrb[14].mxu0 %vm833_vm2, %v2805_v26  ;;  %3902 = vmatmul.mubr.msk.f32.vlgmr.msra.gmra.mrb[24].mxu1 %vm833_vm2, %v2807_v27 }
 0xfd9   : > { %3981 = vmatprep.subr.bf16.mxu0 %v4209_v14  ;;  %3912 = vmatprep.mubr.msk.f32.mxu0 %vm4210_vm1, %v4211_v19 }
 0xfda   : > { %3987 = vmatprep.subr.bf16.mxu1 %v4209_v14  ;;  %3923 = vmatprep.mubr.msk.f32.mxu1 %vm4210_vm1, %v4211_v19 }
 0xfdb   : > { %3983 = vmatpush3.bf16.msra.mxu0 %v3982_v21 }
 0xfdc   : > { %3984 = vmatprep.subr.bf16.mxu0 %v4209_v14 }
 0xfdf   : > { %3986 = vmatpush3.bf16.msra.mxu0 %v3985_v58  ;;  %v3650_v58 = vld [vmem:[%s5017_s4 + $0x70] sm:$0xff] }
 0xfe0   : > { %3993 = vmatprep.subr.bf16.mxu0 %v4209_v14 }
0x10a7   : > { %v2877_v24 = vpop.f32.mrb[12].mxu0  ;;  %v2950_v30 = vpop.f32.mrb[22].mxu1 }
0x10a8   : > { %v3888_v32 = vpop.f32.mrb[13].mxu0  ;;  %v3893_v36 = vpop.f32.mrb[23].mxu1 }
0x10ab   : > { %v3023_v37 = vpop.f32.mrb[14].mxu0  ;;  %v3096_v38 = vpop.f32.mrb[24].mxu1 }
0x10ac   : > { %v3100_v39 = vcombine.low %v2877_v24, %v3023_v37  ;;  %v3101_v40 = vcombine.high %v2877_v24, %v3023_v37  ;;  %v3116_v41 = vcombine.low %v2950_v30, %v3096_v38  ;;  %v3117_v42 = vcombine.high %v2950_v30, %v3096_v38  ;;  %v3898_v43 = vpop.f32.mrb[15].mxu0  ;;  %v3903_v17 = vpop.f32.mrb[25].mxu1 }
0x10ad   : > { %v3354_v43 = vrot.slane %v4686_v55, %v1729_v8  ;;  %v3645_v8 = vld [vmem:[%s5017_s4 + $0x48] sm:$0xff] }
0x10ae   : > { %v3108_v18 = vrot.slane %v3100_v39, %v4452_v44  ;;  %v3115_v31 = vrot.slane %v3101_v40, %v4452_v44  ;;  %v3124_v28 = vrot.slane %v3116_v41, %v4452_v44  ;;  %v3131_v46 = vrot.slane %v3117_v42, %v4452_v44  ;;  %v3641_v39 = vld [vmem:[%s5016_s3 + $0x28] sm:$0xff]  ;;  %v3642_v41 = vld [vmem:[%s5016_s3 + $0x30] sm:$0xff] }
0x10af   : > { %v3994_v55 = vpack.c.bf16 %v3645_v8, %v3644_v3 }
0x10b0   : > { %v3132_v49 = vcombine.low %v3108_v18, %v3124_v28  ;;  %v3133_v50 = vcombine.high %v3108_v18, %v3124_v28  ;;  %v3148_v51 = vcombine.low %v3115_v31, %v3131_v46  ;;  %v3149_v52 = vcombine.high %v3115_v31, %v3131_v46 }
0x10b2   : > { %v3140_v45 = vrot.slane %v3132_v49, %v4463_v53  ;;  %v3147_v48 = vrot.slane %v3133_v50, %v4463_v53  ;;  %v3156_v56 = vrot.slane %v3148_v51, %v4463_v53  ;;  %v3163_v57 = vrot.slane %v3149_v52, %v4463_v53 }
0x10b4   : > { %v3168_v59 = vcombine.low %v3140_v45, %v3147_v48  ;;  %v3672_v60 = vcombine.high %v3140_v45, %v3147_v48  ;;  %v3184_v61 = vcombine.low %v3156_v56, %v3163_v57  ;;  %v3673_v5 = vcombine.high %v3156_v56, %v3163_v57  ;;  %v3648_v48 = vld [vmem:[%s5017_s4 + $0x60] sm:$0xff]  ;;  %v3649_v56 = vld [vmem:[%s5017_s4 + $0x68] sm:$0xff] }
0x10b5   : > { %v3997_v45 = vpack.c.bf16 %v3647_v33, %v3646_v54  ;;  %v4000_v57 = vpack.c.bf16 %v3649_v56, %v3648_v48 }
0x10b6   : > { %v3175_v62 = vrot.slane %v3168_v59, %v4452_v44  ;;  %v3183_v63 = vrot.slane %v3672_v60, %v4452_v44  ;;  %v3191_v0 = vrot.slane %v3184_v61, %v4452_v44  ;;  %v3199_v1 = vrot.slane %v3673_v5, %v4452_v44  ;;  %v3651_v59 = vld [vmem:[%s5017_s4 + $0x78] sm:$0xff] }
0x10b7   : > { %v4003_v60 = vpack.c.bf16 %v3651_v59, %v3650_v58 }
0x10b8   : > { %v3201_v2 = vcombine.high %v3175_v62, %v3183_v63  ;;  %v3217_v34 = vcombine.high %v3191_v0, %v3199_v1  ;;  %v3200_v35 = vcombine.low %v3175_v62, %v3183_v63  ;;  %v3216_v7 = vcombine.low %v3191_v0, %v3199_v1 }
0x10ba   : > { %v3215_v6 = vrot.slane %v3201_v2, %v4463_v53  ;;  %v3231_v9 = vrot.slane %v3217_v34, %v4463_v53  ;;  %v3208_v10 = vrot.slane %v3200_v35, %v4463_v53  ;;  %v3224_v11 = vrot.slane %v3216_v7, %v4463_v53 }
0x10bc   : > { %v3234_v13 = vcombine.low %v3215_v6, %v3231_v9  ;;  %v3233_v16 = vcombine.high %v3208_v10, %v3224_v11  ;;  %v3235_v15 = vcombine.high %v3215_v6, %v3231_v9  ;;  %v3232_v22 = vcombine.low %v3208_v10, %v3224_v11 }
0x10be   : > { %3241 = vrot.lane.b32.xlu1 %v3234_v13, %s4218_s20  ;;  %3237 = vrot.lane.b32.xlu0 %v3233_v16, %s5033_s15  ;;  %s3678_s15 = sshll.u32 %s4279_s25, 7  ;;  %s3517_s25 = scalar_lea.sflag [#allocation4], %s4363_s26 }
0x10bf   : > { %s4968_s8 = scalar_lea.hbm %s5019_s6, %s3678_s15 }
0x10c2   : > { %3245 = vrot.lane.b32.xlu0 %v3235_v15, %s5034_s17  ;;  %3326 = vrot.lane.b32.xlu1 %v4718_v12, %s5035_s28  ;;  %s5036_s17 = sshll.u32 %s4363_s26, 3 }
0x1130   : > { %v3238_v44 = vpop.permute.xlu0 %3237  ;;  %v3242_v23 = vpop.permute.xlu1 %3241 }
0x1131   : > { %v3248_v25 = vsel %vm833_vm2, %v3232_v22, %v3238_v44 }
0x1132   : > { %v3249_v53 = vsel %vm1623_vm3, %v3248_v25, %v3242_v23 }
0x1134   : > { %v3246_v26 = vpop.permute.xlu0 %3245  ;;  %v3327_v20 = vpop.permute.xlu1 %3326 }
0x1135   : > { %v3250_v27 = vsel %vm1625_vm4, %v3249_v53, %v3246_v26 }
0x1136   : > { %3913 = vmatmul.mubr.msk.f32.vlgmr.msra.gmra.mrb[16].mxu0 %vm289_vm0, %v3250_v27 }
0x1137   : > { %3942 = vmatprep.mubr.msk.f32.mxu0 %vm4210_vm1, %v4211_v19  ;;  %3995 = vmatpush3.bf16.msra.mxu0 %v3994_v55 }
0x1138   : > { %3996 = vmatprep.subr.bf16.mxu0 %v4209_v14 }
0x113b   : > { %3998 = vmatpush3.bf16.msra.mxu0 %v3997_v45 }
0x113c   : > { %3999 = vmatprep.subr.bf16.mxu0 %v4209_v14 }
0x113f   : > { %4001 = vmatpush3.bf16.msra.mxu0 %v4000_v57 }
0x1140   : > { %4002 = vmatprep.subr.bf16.mxu0 %v4209_v14 }
0x1143   : > { %4004 = vmatpush3.bf16.msra.mxu0 %v4003_v60 }
0x1209   : > { %v3320_v4 = vpop.f32.mrb[16].mxu0 }
0x120a   : > { %v3324_v21 = vadd.f32 %v3320_v4, %v4679_v47  ;;  %v3914_v24 = vpop.f32.mrb[17].mxu0  ;;  %v3640_v47 = vld [vmem:[%s5016_s3 + $0x20] sm:$0xff] }
0x120b   : > { %v3988_v40 = vpack.c.bf16 %v3641_v39, %v3640_v47 }
0x120c   : > { %v4905_v12 = vadd.f32 %v3327_v20, %v3324_v21 }
0x120d   : > { %3989 = vmatpush3.bf16.msra.mxu1 %v3988_v40 }
0x120e   : > { %v3330_v30 = vsel %vm289_vm0, %v4905_v12, 0.0  ;;  %3990 = vmatprep.subr.bf16.mxu1 %v4209_v14 }
0x120f   : > { %3331 = vadd.xlane.f32.xlu0 %v3330_v30 }
0x1225   : > { %3343 = vrot.lane.b32.xlu0 %v4691_v29, %s4217_s18 }
0x1229   : > { %3438 = vrot.lane.b32.xlu0 %v3354_v43, %s4217_s18  ;;  %s266_s18 = scalar_lea.vmem [#allocation5], %s5036_s17 }
0x129c   : > { %v3332_v32 = vpop.xlane.xlu0 %3331 }
0x129d   : > { %v3333_v36 = vmul.f32 0.03125, %v3332_v32 }
0x129f   : > { %v3334_v37 = vsub.f32 %v4905_v12, %v3333_v36 }
0x12a0   : > { %v3344_v46 = vpop.permute.xlu0 %3343 }
0x12a1   : > { %v3335_v38 = vmul.f32 %v3334_v37, %v3334_v37 }
0x12a3   : > { %v3336_v19 = vsel %vm289_vm0, %v3335_v38, 0.0 }
0x12a4   : > { %3337 = vadd.xlane.f32.xlu1 %v3336_v19  ;;  %v3439_v9 = vpop.permute.xlu0 %3438 }
0x12b5   : > { %3347 = vrot.lane.b32.xlu1 %v4691_v29, %s5035_s28  ;;  %v3643_v29 = vld [vmem:[%s5016_s3 + $0x38] sm:$0xff]  ;;  %s3530_s28 = sshll.u32 %s266_s18, 4  ;;  %s4970_s28 = int_to_ptr.vmem [resolvable:$true] %s3530_s28 }
0x12b6   : > { %v3991_v42 = vpack.c.bf16 %v3643_v29, %v3642_v41  ;;  %s4139_s29 = scalar_lea.vmem %s4970_s28, 128  ;;  %p4146_p7 = scmp.lt.s32.totalorder %s4970_s28, %s4144_s16 }
0x12b7   : > { %p4140_p6 = scmp.ne.s32.totalorder %s4970_s28, %s4139_s29  ;;  %p4147_p10 = scmp.lt.s32.totalorder %s4145_s12, %s4139_s29 }
0x12b8   : > { %3992 = vmatpush3.bf16.msra.mxu1 %v3991_v42 }
0x12b9   : > { %p4141_p12 = pnand %p4140_p6, %p5037_p11  ;;  %p4148_p2 = por %p4147_p10, %p4146_p7 }
0x12bb   : > { %p4142_p13 = pneg %p4141_p12 }
0x12bd   : > { %p4149_p4 = pnand %p4148_p2, %p4142_p13 }
0x1331   : > { %v3338_v17 = vpop.xlane.xlu1 %3337 }
0x1332   : > { %v3339_v18 = vmul.f32 0.03125, %v3338_v17 }
0x1334   : > { %v3340_v31 = vadd.f32 1e-05, %v3339_v18 }
0x1335   : > { %v3348_v50 = vpop.permute.xlu1 %3347 }
0x1336   : > { %4105 = vrsqrt.f32 %v3340_v31 }
0x1340   : > { %v4106_v28 = vpop.eup %4105 }
0x1341   : > { %v3342_v49 = vmul.f32 %v4106_v28, %v3334_v37 }
0x1343   : > { %v3346_v51 = vmul.f32 %v3344_v46, %v3342_v49 }
0x1345   : > { %v3350_v52 = vadd.f32 %v3348_v50, %v3346_v51 }
0x1347   : > { %3924 = vmatmul.mubr.msk.f32.vlgmr.msra.gmra.mrb[26].mxu1 %vm289_vm0, %v3350_v52 }
0x141a   : > { %v3424_v61 = vpop.f32.mrb[26].mxu1 }
0x141b   : > { %v3425_v5 = vadd.f32 %v3424_v61, %v3354_v43  ;;  %v3925_v62 = vpop.f32.mrb[27].mxu1 }
0x141d   : > { %v3429_v63 = vmul.f32 %v3425_v5, %v3425_v5  ;;  %v3428_v35 = vmul.f32 0.5, %v3425_v5 }
0x141f   : > { %v3430_v0 = vmul.f32 %v3429_v63, %v3425_v5 }
0x1421   : > { %v3431_v1 = vmul.f32 0.044715, %v3430_v0 }
0x1423   : > { %v3432_v2 = vadd.f32 %v3431_v1, %v3425_v5 }
0x1425   : > { %v3433_v14 = vmul.f32 0.7978845, %v3432_v2 }
0x1427   : > { %4107 = vtanh.f32 %v3433_v14 }
0x1431   : > { %v4108_v34 = vpop.eup %4107 }
0x1432   : > { %v3435_v7 = vadd.f32 1.0, %v4108_v34 }
0x1434   : > { %v3436_v6 = vmul.f32 %v3435_v7, %v3428_v35 }
0x1436   : > { %3943 = vmatmul.mubr.msk.f32.vlgmr.msra.gmra.mrb[18].mxu0 %vm1817_vm5, %v3436_v6 }
0x1509   : > { %v3510_v10 = vpop.f32.mrb[18].mxu0 }
0x150a   : > { %v3511_v11 = vadd.f32 %v3510_v10, %v3439_v9  ;;  %v3944_v13 = vpop.f32.mrb[19].mxu0 }
0x150c   : > { %v3514_v16 = vadd.f32 %v3511_v11, %v4905_v12 }
0x150e   : > { %3515 = vst.msk [vmem:[%s266_s18] sm:$0xff] %vm289_vm0, %v3514_v16 }
0x150f   : > { %4152 = shalt.err (!%p4149_p4)
}
0x1510   : > { %s4153_s26 = scalar_lea.hbm %s4968_s8, 128  ;;  %s4157_s14 = scalar_lea.hbm %s5019_s6, 256 }
0x1511   : > { %p4154_p5 = scmp.ne.s32.totalorder %s4968_s8, %s4153_s26  ;;  %p4158_p0 = scmp.lt.u32.totalorder %s4968_s8, %s5019_s6 }
0x1512   : > { %p4159_p1 = scmp.lt.u32.totalorder %s4157_s14, %s4153_s26  ;;  %p4161_p6 = scmp.lt.u32.totalorder %s4153_s26, %s4968_s8 }
0x1513   : > { %p4155_p8 = pnand %p4154_p5, %p5037_p11 }
0x1514   : > { %p4160_p3 = por %p4159_p1, %p4158_p0 }
0x1515   : > { %p4156_p9 = pneg %p4155_p8 }
0x1516   : > { %p4162_p12 = por %p4161_p6, %p4160_p3 }
0x1518   : > { %p4163_p13 = pnand %p4162_p12, %p4156_p9 }
0x151a   : > { %4166 = shalt.err (!%p4163_p13)
}
0x151b   : > { %4007 = dma.vmem_to_hbm [thread:$0]  (%p5037_p11), %s4970_s28, 128, %s4968_s8, %s3517_s25  }
0x151c PF: > { %s3542_s18 = sand.u32 1, %s4193_s21   ;;  %p5038_p7 = scmp.ne.s32.totalorder %s5029_s10, 0 }
0x151d   : > { %p5039_p10 = scmp.ge.s32.totalorder %s4205_s24, 2  ;;  %s3543_s20 = scalar_lea.sflag [#allocation4], %s3542_s18 }
0x151f   : > { %p4014_p2 = pnand %p5039_p10, %p5038_p7 }
0x1521   : > { %4188 = dma.done.wait (!%p4014_p2), %s3543_s20, 128  }
0x1522   : > { %4190 = vsyncadd (!%p4014_p2), %s3543_s20, 4294967168  ;;  %p19_p4 = scmp.ge.s32.totalorder %s4283_s27, 4   ;;  %s5040_s21 = smov %s4197_s22 }
0x1523   : > { %s5041_s22 = smov %s4201_s23  ;;  %s5042_s23 = smov %s4295_s30 }
0x1524   : > { %s5043_s24 = smov %s4283_s27  ;;  %21 = sbr.rel (!%p19_p4) target bundleno = 5 (0x5), region = 94 }
0x152b   :  { %3548 = vsyncpa [#allocation3], 1 }
0x152c   :  { %3550 = vsyncpa [#allocation3 + $0x1], 1 }
0x152d   :  { %3551 = vsyncpa [#allocation4], 1 }
0x152e   :  { %3553 = vsyncpa [#allocation4 + $0x1], 1 }

</bundles_post_ra>
